<compile_context>
chip_gen: v7x
topology: tpu7x:2x2x1
jax: 0.10.0
libtpu: 0.0.40
codegen_flags: <defaults>
</compile_context>

<pallas_src>
import jax
import jax.numpy as jnp
from jax.experimental import pallas as pl
from jax.experimental.pallas import tpu as pltpu

C_IN = 440
C_MID = 110
H = W = 7
HW = H * W


def se_conv_kernel(s_ref, x_ref, w1t_ref, b1_ref, w2t_ref, b2_ref, w3_ref, o_ref):
    # Squeeze-excitation MLP on the pooled vector s: [1, 440] (lane-major).
    s = s_ref[...]                                                      # [1, 440] f32
    h = jnp.dot(s.astype(jnp.bfloat16), w1t_ref[...],
                preferred_element_type=jnp.float32)                     # [1, 110]
    h = jnp.maximum(h + b1_ref[...], 0.0)                               # ReLU (f32)
    g = jnp.dot(h.astype(jnp.bfloat16), w2t_ref[...],
                preferred_element_type=jnp.float32)                     # [1, 440]
    g = jax.nn.sigmoid(g + b2_ref[...])                                 # gate (f32)

    # Fold the per-channel gate into the columns of w3:
    #   out[o, p] = sum_c w3[o, c] * g[c] * x[c, p]
    # g is a [1, 440] lane-major row broadcast over w3's 440 sublane rows (VPU).
    w3g = (w3_ref[...] * g).astype(jnp.bfloat16)                        # [440, 440]

    # Final 1x1 conv (no bias) in native channel-major layout: [440,440]@[440,49].
    o_ref[...] = jnp.dot(w3g, x_ref[...].astype(jnp.bfloat16),
                         preferred_element_type=jnp.float32)            # [440, 49]


def prepare_params(w1, b1, w2, b2, w3):
    """One-time weight prep (transpose + bf16 cast), hoisted out of the hot path."""
    return dict(
        w1t=jnp.transpose(w1).astype(jnp.bfloat16),        # [440, 110]
        b1=b1.reshape(1, C_MID).astype(jnp.float32),       # [1, 110]
        w2t=jnp.transpose(w2).astype(jnp.bfloat16),        # [110, 440]
        b2=b2.reshape(1, C_IN).astype(jnp.float32),        # [1, 440]
        w3=w3.astype(jnp.bfloat16),                        # [440, 440] (used as-is)
    )


@jax.jit
def se_conv_block(x210, x209, params):
    """x210: [1,440,1,1], x209: [1,440,7,7] (NCHW, f32) -> [1,440,7,7] f32."""
    # Free (contiguous) reshapes only -- no transposes, no extra XLA copies.
    x = x209.reshape(C_IN, HW)                             # [440, 49] channel-major
    s = x210.reshape(1, C_IN)                              # [1, 440]  lane-major

    vmem = pl.BlockSpec(memory_space=pltpu.MemorySpace.VMEM)
    flops = 2 * C_IN * C_IN * HW + 4 * C_IN * C_MID + C_IN * C_IN
    bytes_accessed = (
        s.size * 4 + x.size * 4                             # activations in
        + 2 * C_IN * C_MID * 2 + (C_MID + C_IN) * 4         # SE weights + biases
        + C_IN * C_IN * 2                                   # w3 (bf16)
        + C_IN * HW * 4                                     # output
    )
    out = pl.pallas_call(
        se_conv_kernel,
        out_shape=jax.ShapeDtypeStruct((C_IN, HW), jnp.float32),
        in_specs=[vmem] * 7,
        out_specs=vmem,
        cost_estimate=pl.CostEstimate(flops=flops, transcendentals=C_IN,
                                      bytes_accessed=bytes_accessed),
    )(s, x, params["w1t"], params["b1"], params["w2t"], params["b2"], params["w3"])

    return out.reshape(1, C_IN, H, W)                      # free reshape back to NCHW


def _init_params(key):
    k1, k2, k3, k4, k5 = jax.random.split(key, 5)
    # Deterministic, PyTorch-like uniform fan-in init (1x1 convs -> fan_in = Cin).
    lim1 = 1.0 / (C_IN ** 0.5)
    lim2 = 1.0 / (C_MID ** 0.5)
    w1 = jax.random.uniform(k1, (C_MID, C_IN), jnp.float32, -lim1, lim1)
    b1 = jax.random.uniform(k2, (C_MID,), jnp.float32, -lim1, lim1)
    w2 = jax.random.uniform(k3, (C_IN, C_MID), jnp.float32, -lim2, lim2)
    b2 = jax.random.uniform(k4, (C_IN,), jnp.float32, -lim2, lim2)
    w3 = jax.random.uniform(k5, (C_IN, C_IN), jnp.float32, -lim1, lim1)
    return w1, b1, w2, b2, w3


def _reference(x209, x210, w1, b1, w2, b2, w3):
    # Pure-JAX f32 reference of the PyTorch forward for a sanity check.
    s = x210.reshape(C_IN)
    h = jnp.maximum(w1 @ s + b1, 0.0)
    g = jax.nn.sigmoid(w2 @ h + b2)                        # [440]
    y = g[None, :, None, None] * x209                      # [1,440,7,7]
    out = jnp.einsum('oc,nchw->nohw', w3, y)
    return out


if __name__ == "__main__":
    key = jax.random.PRNGKey(0)
    kx, ks, kp = jax.random.split(key, 3)

    x209 = jax.random.normal(kx, (1, C_IN, H, W), jnp.float32)
    x210 = jax.random.normal(ks, (1, C_IN, 1, 1), jnp.float32)
    w1, b1, w2, b2, w3 = _init_params(kp)

    # One-time weight prep (cached across calls in a real model).
    params = jax.tree_util.tree_map(jax.block_until_ready, prepare_params(w1, b1, w2, b2, w3))

    out = se_conv_block(x210, x209, params)
    out = jax.block_until_ready(out)

    ref = _reference(x209, x210, w1, b1, w2, b2, w3)
    assert out.shape == (1, C_IN, H, W)
    # bf16 matmul operands with f32 accumulation (K=440) -> loosened tolerance.
    assert jnp.allclose(out, ref, atol=3e-2, rtol=3e-2)

    print("KERNEL_OK")
</pallas_src>

<mosaic_0001>
module attributes {stable_mosaic.version = 11 : i64} {
  func.func @se_conv_kernel(%arg0: memref<1x440xf32, #tpu.memory_space<vmem>>, %arg1: memref<440x49xf32, #tpu.memory_space<vmem>>, %arg2: memref<440x110xbf16, #tpu.memory_space<vmem>>, %arg3: memref<1x110xf32, #tpu.memory_space<vmem>>, %arg4: memref<110x440xbf16, #tpu.memory_space<vmem>>, %arg5: memref<1x440xf32, #tpu.memory_space<vmem>>, %arg6: memref<440x440xbf16, #tpu.memory_space<vmem>>, %arg7: memref<440x49xf32, #tpu.memory_space<vmem>>) attributes {dimension_semantics = [], scalar_prefetch = 0 : i64, scratch_operands = 0 : i64, tpu.core_type = #tpu.core_type<tc>} {
    %c0 = arith.constant 0 : index
    %c0_0 = arith.constant 0 : index
    %0 = vector.load %arg0[%c0, %c0_0] : memref<1x440xf32, #tpu.memory_space<vmem>>, vector<1x440xf32>
    %1 = arith.truncf %0 : vector<1x440xf32> to vector<1x440xbf16>
    %c0_1 = arith.constant 0 : index
    %c0_2 = arith.constant 0 : index
    %2 = vector.load %arg2[%c0_1, %c0_2] : memref<440x110xbf16, #tpu.memory_space<vmem>>, vector<440x110xbf16>
    %cst = arith.constant dense<0.000000e+00> : vector<1x110xf32>
    %3 = tpu.matmul %1, %2, %cst {dimension_numbers = #tpu.dot_dimension_numbers<[1], [0], [0], [1], [0, 0, 1, 1], [], []>} : vector<1x440xbf16>, vector<440x110xbf16>, vector<1x110xf32> -> vector<1x110xf32>
    %c0_3 = arith.constant 0 : index
    %c0_4 = arith.constant 0 : index
    %4 = vector.load %arg3[%c0_3, %c0_4] : memref<1x110xf32, #tpu.memory_space<vmem>>, vector<1x110xf32>
    %5 = arith.addf %3, %4 : vector<1x110xf32>
    %cst_5 = arith.constant 0.000000e+00 : f32
    %6 = vector.broadcast %cst_5 : f32 to vector<1x110xf32>
    %7 = arith.maximumf %5, %6 : vector<1x110xf32>
    %8 = arith.truncf %7 : vector<1x110xf32> to vector<1x110xbf16>
    %c0_6 = arith.constant 0 : index
    %c0_7 = arith.constant 0 : index
    %9 = vector.load %arg4[%c0_6, %c0_7] : memref<110x440xbf16, #tpu.memory_space<vmem>>, vector<110x440xbf16>
    %cst_8 = arith.constant dense<0.000000e+00> : vector<1x440xf32>
    %10 = tpu.matmul %8, %9, %cst_8 {dimension_numbers = #tpu.dot_dimension_numbers<[1], [0], [0], [1], [0, 0, 1, 1], [], []>} : vector<1x110xbf16>, vector<110x440xbf16>, vector<1x440xf32> -> vector<1x440xf32>
    %c0_9 = arith.constant 0 : index
    %c0_10 = arith.constant 0 : index
    %11 = vector.load %arg5[%c0_9, %c0_10] : memref<1x440xf32, #tpu.memory_space<vmem>>, vector<1x440xf32>
    %12 = arith.addf %10, %11 : vector<1x440xf32>
    %13 = arith.negf %12 : vector<1x440xf32>
    %14 = math.exp %13 : vector<1x440xf32>
    %cst_11 = arith.constant 1.000000e+00 : f32
    %15 = vector.broadcast %cst_11 : f32 to vector<1x440xf32>
    %16 = arith.addf %15, %14 : vector<1x440xf32>
    %17 = arith.divf %15, %16 : vector<1x440xf32>
    %c0_12 = arith.constant 0 : index
    %c0_13 = arith.constant 0 : index
    %18 = vector.load %arg6[%c0_12, %c0_13] : memref<440x440xbf16, #tpu.memory_space<vmem>>, vector<440x440xbf16>
    %19 = arith.extf %18 : vector<440x440xbf16> to vector<440x440xf32>
    %20 = vector.broadcast %17 : vector<1x440xf32> to vector<440x440xf32>
    %21 = arith.mulf %19, %20 : vector<440x440xf32>
    %22 = arith.truncf %21 : vector<440x440xf32> to vector<440x440xbf16>
    %c0_14 = arith.constant 0 : index
    %c0_15 = arith.constant 0 : index
    %23 = vector.load %arg1[%c0_14, %c0_15] : memref<440x49xf32, #tpu.memory_space<vmem>>, vector<440x49xf32>
    %24 = arith.truncf %23 : vector<440x49xf32> to vector<440x49xbf16>
    %cst_16 = arith.constant dense<0.000000e+00> : vector<440x49xf32>
    %25 = tpu.matmul %22, %24, %cst_16 {dimension_numbers = #tpu.dot_dimension_numbers<[1], [0], [0], [1], [0, 0, 1, 1], [], []>} : vector<440x440xbf16>, vector<440x49xbf16>, vector<440x49xf32> -> vector<440x49xf32>
    %c0_17 = arith.constant 0 : index
    %c0_18 = arith.constant 0 : index
    %26 = vector.load %arg7[%c0_17, %c0_18] : memref<440x49xf32, #tpu.memory_space<vmem>>, vector<440x49xf32>
    tpu.vector_store %arg7[%c0_17, %c0_18], %25 {strides = array<i32>} : memref<440x49xf32, #tpu.memory_space<vmem>>, vector<440x49xf32>,
    return
  }
}

</mosaic_0001>

<bundles_post_ra>
// kernel: se_conv_block.1
= control target key start
LH: loop header
LB: loop body
LE: loop exit
PB: predicated region body
PF: predicated region fallthrough
CT: control target
= control target key end

     0   :  { %v2350_v0 = vmov 0   ;;  %v29_v15 = vlaneseq  ;;  %vm274_vm0 = vcmask 457728   ;;  %vm278_vm1 = vcmask 1043456   ;;  %s3610_s2 = inlined_call_operand.vmem [shape: bf16[440,110], index: 2, kind: input, shape index: {}]   ;;  %s3611_s0 = inlined_call_operand.vmem [shape: f32[1,440], index: 0, kind: input, shape index: {}]   ;;  %s3612_s4 = inlined_call_operand.vmem [shape: bf16[110,440], index: 4, kind: input, shape index: {}]   ;;  %s3613_s3 = inlined_call_operand.vmem [shape: f32[1,110], index: 3, kind: input, shape index: {}]   ;;  %s3614_s1 = inlined_call_operand.vmem [shape: f32[440,49], index: 1, kind: input, shape index: {}]   ;;  %s3615_s5 = inlined_call_operand.vmem [shape: f32[1,440], index: 5, kind: input, shape index: {}]   ;;  %s3616_s6 = inlined_call_operand.vmem [shape: bf16[440,440], index: 6, kind: input, shape index: {}]   ;;  %s3617_s7 = inlined_call_operand.vmem [shape: f32[440,49], index: 7, kind: output, shape index: {}]  }
   0x1   :  { %322 = vmatprep.subr.bf16.mxu1 %v2350_v0  ;;  %v2264_v1 = vld [vmem:[%s3610_s2 + $0x80] sm:$0xff]   ;;  %v2265_v2 = vld [vmem:[%s3610_s2 + $0x88] sm:$0xff]   ;;  %v2268_v5 = vld [vmem:[%s3610_s2 + $0x90] sm:$0xff]   ;;  %vm554_vm2 = vcmask 1046528   ;;  %vm550_vm3 = vcmask 900096   ;;  %vm2033_vm4 = vcmask 400384  }
   0x2   :  { %323 = vmatpush1.bf16.msra.mxu1 %v2264_v1  ;;  %v2266_v3 = vld [vmem:[%s3610_s2 + $0x40] sm:$0xff]   ;;  %v2269_v6 = vld [vmem:[%s3610_s2 + $0x48] sm:$0xff]   ;;  %v2272_v8 = vld [vmem:[%s3610_s2 + $0x50] sm:$0xff]   ;;  %v2448_v19 = vshrl.u32 %v29_v15, 7 }
   0x3   :  { %324 = vmatprep.subr.bf16.mxu1 %v2350_v0  ;;  %v2267_v4 = vld [vmem:[%s3610_s2] sm:$0xff]   ;;  %2186 = vmatprep.subr.bf16.mxu0 %v2266_v3  ;;  %v2270_v7 = vld [vmem:[%s3610_s2 + $0x8] sm:$0xff]   ;;  %v2273_v9 = vld [vmem:[%s3610_s2 + $0x10] sm:$0xff]  }
   0x4   :  { %2187 = vmatpush3.bf16.msra.mxu0 %v2267_v4  ;;  %v2271_v10 = vld [vmem:[%s3610_s2 + $0x98] sm:$0xff]   ;;  %v2274_v12 = vld [vmem:[%s3610_s2 + $0xa0] sm:$0xff]   ;;  %v2277_v16 = vld [vmem:[%s3610_s2 + $0xa8] sm:$0xff]   ;;  %v35_v23 = vsub.s32 1, %v2448_v19  ;;  %v43_v24 = vsub.s32 3, %v2448_v19  ;;  %v2469_v27 = vsub.s32 0, %v2448_v19 }
   0x5   :  { %2188 = vmatprep.subr.bf16.mxu0 %v2269_v6  ;;  %v2275_v11 = vld [vmem:[%s3610_s2 + $0x58] sm:$0xff]   ;;  %v2278_v14 = vld [vmem:[%s3610_s2 + $0x60] sm:$0xff]   ;;  %v2281_v18 = vld [vmem:[%s3610_s2 + $0x68] sm:$0xff]   ;;  %v39_v43 = vsub.s32 2, %v2448_v19 }
   0x6   :  { %325 = vmatpush1.bf16.msra.mxu1 %v2265_v2  ;;  %v2276_v13 = vld [vmem:[%s3610_s2 + $0x18] sm:$0xff]   ;;  %v2279_v17 = vld [vmem:[%s3610_s2 + $0x20] sm:$0xff]   ;;  %v2280_v20 = vld [vmem:[%s3610_s2 + $0xb0] sm:$0xff]  }
   0x7   :  { %326 = vmatprep.subr.bf16.mxu1 %v2350_v0  ;;  %v2282_v21 = vld [vmem:[%s3610_s2 + $0x28] sm:$0xff]   ;;  %v2284_v22 = vld [vmem:[%s3610_s2 + $0x70] sm:$0xff]   ;;  %v2283_v25 = vld [vmem:[%s3610_s2 + $0xb8] sm:$0xff]  }
   0x8   :  { %2189 = vmatpush3.bf16.msra.mxu0 %v2270_v7  ;;  %v2285_v26 = vld [vmem:[%s3610_s2 + $0x30] sm:$0xff]   ;;  %v2287_v28 = vld [vmem:[%s3610_s2 + $0x78] sm:$0xff]   ;;  %v27_v29 = vld [vmem:[%s3611_s0] sm:$0xf] }
   0x9   :  { %2190 = vmatprep.subr.bf16.mxu0 %v2272_v8  ;;  %v36_v30 = vrot.slane %v27_v29, %v35_v23  ;;  %v44_v31 = vrot.slane %v27_v29, %v43_v24  ;;  %v32_v32 = vrot.slane %v27_v29, %v2469_v27  ;;  %v2288_v33 = vld [vmem:[%s3610_s2 + $0x38] sm:$0xff]   ;;  %v2286_v36 = vld [vmem:[%s3610_s2 + $0xc0] sm:$0xff]   ;;  %v2289_v40 = vld [vmem:[%s3610_s2 + $0xc8] sm:$0xff]   ;;  %v40_v48 = vrot.slane %v27_v29, %v39_v43 }
   0xa   :  { %327 = vmatpush1.bf16.msra.mxu1 %v2268_v5  ;;  %v2294_v37 = vld [vmem:[%s3612_s4 + $0x4] ss:$16 sps:$4 sm:$0xff]   ;;  %v2292_v39 = vld [vmem:[%s3612_s4] ss:$16 sps:$4 sm:$0xff]   ;;  %v2291_v45 = vld [vmem:[%s3610_s2 + $0xd8] ss:$0 sps:$4 sm:$0xff]  }
   0xb   :  { %328 = vmatprep.subr.bf16.mxu1 %v2350_v0  ;;  %v50_v34 = vpack.c.bf16 %v36_v30, %v36_v30  ;;  %v52_v35 = vpack.c.bf16 %v44_v31, %v44_v31  ;;  %v49_v38 = vpack.c.bf16 %v32_v32, %v32_v32  ;;  %v2300_v41 = vld [vmem:[%s3612_s4 + $0x24] ss:$16 sps:$4 sm:$0xff]   ;;  %v2298_v44 = vld [vmem:[%s3612_s4 + $0x20] ss:$16 sps:$4 sm:$0xff]   ;;  %v280_v50 = vsel %vm278_vm1, %v2291_v45, 0  ;;  %v1384_v29 = vld [vmem:[%s3614_s1 + $0x108] sm:$0xff] }
   0xc   :  { %2191 = vmatpush3.bf16.msra.mxu0 %v2273_v9  ;;  %v2290_v42 = vld [vmem:[%s3610_s2 + $0xd0] sm:$0xff]   ;;  %v2297_v51 = vld [vmem:[%s3612_s4 + $0xc] ss:$16 sps:$4 sm:$0xff]   ;;  %v51_v52 = vpack.c.bf16 %v40_v48, %v40_v48  ;;  %v2295_v54 = vld [vmem:[%s3612_s4 + $0x8] ss:$16 sps:$4 sm:$0xff]  }
   0xd   :  { %2192 = vmatprep.subr.bf16.mxu0 %v2275_v11  ;;  %314 = vmatprep.mubr.bf16.mxu0 %v50_v34  ;;  %v2306_v46 = vld [vmem:[%s3612_s4 + $0x44] ss:$16 sps:$4 sm:$0xff]   ;;  %v2304_v47 = vld [vmem:[%s3612_s4 + $0x40] ss:$16 sps:$4 sm:$0xff]   ;;  %v2303_v55 = vld [vmem:[%s3612_s4 + $0x2c] ss:$16 sps:$4 sm:$0xff]  }
   0xe   :  { %329 = vmatpush1.bf16.msra.mxu1 %v2271_v10  ;;  %2121 = vmatprep.mubr.msk.bf16.mxu1 %vm274_vm0, %v52_v35  ;;  %v2312_v49 = vld [vmem:[%s3612_s4 + $0x64] ss:$16 sps:$4 sm:$0xff]   ;;  %v2310_v53 = vld [vmem:[%s3612_s4 + $0x60] ss:$16 sps:$4 sm:$0xff]   ;;  %v2301_v56 = vld [vmem:[%s3612_s4 + $0x28] ss:$16 sps:$4 sm:$0xff]  }
   0xf   :  { %330 = vmatprep.subr.bf16.mxu1 %v2350_v0  ;;  %v2309_v57 = vld [vmem:[%s3612_s4 + $0x4c] ss:$16 sps:$4 sm:$0xff]   ;;  %v2307_v58 = vld [vmem:[%s3612_s4 + $0x48] ss:$16 sps:$4 sm:$0xff]   ;;  %v2316_v61 = vld [vmem:[%s3612_s4 + $0x80] ss:$16 sps:$4 sm:$0xff]  }
  0x10   :  { %2193 = vmatpush3.bf16.msra.mxu0 %v2276_v13  ;;  %v2315_v59 = vld [vmem:[%s3612_s4 + $0x6c] ss:$16 sps:$4 sm:$0xff]   ;;  %v2313_v60 = vld [vmem:[%s3612_s4 + $0x68] ss:$16 sps:$4 sm:$0xff]   ;;  %v2318_v62 = vld [vmem:[%s3612_s4 + $0x84] ss:$16 sps:$4 sm:$0xff]  }
  0x11   :  { %2194 = vmatprep.subr.bf16.mxu0 %v2278_v14  ;;  %v2319_v63 = vld [vmem:[%s3612_s4 + $0x88] ss:$16 sps:$4 sm:$0xff]   ;;  %v2321_v1 = vld [vmem:[%s3612_s4 + $0x8c] ss:$16 sps:$4 sm:$0xff]   ;;  %v2324_v2 = vld [vmem:[%s3612_s4 + $0xa4] ss:$16 sps:$4 sm:$0xff]  }
  0x12   :  { %331 = vmatpush1.bf16.msra.mxu1 %v2274_v12  ;;  %v2327_v3 = vld [vmem:[%s3612_s4 + $0xac] ss:$16 sps:$4 sm:$0xff]   ;;  %v2322_v4 = vld [vmem:[%s3612_s4 + $0xa0] ss:$16 sps:$4 sm:$0xff]   ;;  %v2325_v5 = vld [vmem:[%s3612_s4 + $0xa8] ss:$16 sps:$4 sm:$0xff]  }
  0x13   :  { %332 = vmatprep.subr.bf16.mxu1 %v2350_v0  ;;  %v2328_v6 = vld [vmem:[%s3612_s4 + $0xc4] ss:$16 sps:$4 sm:$0x7f]   ;;  %v2330_v7 = vld [vmem:[%s3612_s4 + $0xcc] ss:$16 sps:$4 sm:$0x7f]  }
  0x14   :  { %2195 = vmatpush3.bf16.msra.mxu0 %v2279_v17  ;;  %v2332_v8 = vld [vmem:[%s3612_s4 + $0xc0] ss:$16 sps:$4 sm:$0x7f]   ;;  %v2333_v9 = vld [vmem:[%s3612_s4 + $0xc8] ss:$16 sps:$4 sm:$0x7f]  }
  0x15   :  { %2196 = vmatprep.subr.bf16.mxu0 %v2281_v18  ;;  %v556_v10 = vsel %vm554_vm2, %v2332_v8, 0  ;;  %v562_v11 = vsel %vm554_vm2, %v2333_v9, 0  ;;  %v108_v17 = vld [vmem:[%s3613_s3] sm:$0x1]  ;;  %v1353_v34 = vld [vmem:[%s3614_s1 + $0x10] sm:$0xff]  ;;  %v1392_v8 = vld [vmem:[%s3614_s1 + $0x148] sm:$0xff] }
  0x16   :  { %333 = vmatpush1.bf16.msra.mxu1 %v2277_v16  ;;  %v1387_v45 = vld [vmem:[%s3614_s1 + $0x120] sm:$0xff] }
  0x17   :  { %334 = vmatprep.subr.bf16.mxu1 %v2350_v0 }
  0x18   :  { %2197 = vmatpush3.bf16.msra.mxu0 %v2282_v21  ;;  %v1351_v21 = vld [vmem:[%s3614_s1] sm:$0xff] }
  0x19   :  { %2198 = vmatprep.subr.bf16.mxu0 %v2284_v22 }
  0x1a   :  { %335 = vmatpush1.bf16.msra.mxu1 %v2280_v20 }
  0x1b   :  { %336 = vmatprep.subr.bf16.mxu1 %v2350_v0 }
  0x1c   :  { %2199 = vmatpush3.bf16.msra.mxu0 %v2285_v26  ;;  %v1352_v26 = vld [vmem:[%s3614_s1 + $0x8] sm:$0xff] }
  0x1d   :  { %2200 = vmatprep.subr.bf16.mxu0 %v2287_v28  ;;  %v1383_v28 = vld [vmem:[%s3614_s1 + $0x100] sm:$0xff] }
  0x1e   :  { %337 = vmatpush1.bf16.msra.mxu1 %v2283_v25  ;;  %v1422_v35 = vpack.c.bf16 %v1384_v29, %v1383_v28  ;;  %v1397_v28 = vld [vmem:[%s3614_s1 + $0x170] sm:$0xff] }
  0x1f   :  { %338 = vmatprep.subr.bf16.mxu1 %v2350_v0 }
  0x20   :  { %2201 = vmatpush3.bf16.msra.mxu0 %v2288_v33  ;;  %v1406_v33 = vpack.c.bf16 %v1352_v26, %v1351_v21  ;;  %v1396_v21 = vld [vmem:[%s3614_s1 + $0x168] sm:$0xff]  ;;  %v1374_v26 = vld [vmem:[%s3614_s1 + $0xb8] sm:$0xff] }
  0x21   :  { %567 = vmatprep.subr.bf16.mxu0 %v2294_v37  ;;  %v1354_v37 = vld [vmem:[%s3614_s1 + $0x18] sm:$0xff] }
  0x22   :  { %339 = vmatpush1.bf16.msra.mxu1 %v2286_v36 }
  0x23   :  { %340 = vmatprep.subr.bf16.mxu1 %v2350_v0  ;;  %315 = vmatmul.mubr.bf16.vlgmr.msra.gmra.mrb[0].mxu0 %v49_v38  ;;  %v1385_v38 = vld [vmem:[%s3614_s1 + $0x110] sm:$0xff] }
  0x24   :  { %568 = vmatpush1.bf16.msra.mxu0 %v2292_v39  ;;  %599 = vmatprep.mubr.bf16.mxu0 %v2350_v0  ;;  %v1386_v39 = vld [vmem:[%s3614_s1 + $0x118] sm:$0xff] }
  0x25   :  { %569 = vmatprep.subr.bf16.mxu0 %v2300_v41  ;;  %v1355_v41 = vld [vmem:[%s3614_s1 + $0x20] sm:$0xff] }
  0x26   :  { %341 = vmatpush1.bf16.msra.mxu1 %v2289_v40  ;;  %v1407_v40 = vpack.c.bf16 %v1354_v37, %v1353_v34  ;;  %v1399_v34 = vld [vmem:[%s3614_s1 + $0x180] sm:$0xff] }
  0x27   :  { %342 = vmatprep.subr.bf16.mxu1 %v2350_v0 }
  0x28   :  { %570 = vmatpush1.bf16.msra.mxu0 %v2298_v44  ;;  %v1356_v44 = vld [vmem:[%s3614_s1 + $0x28] sm:$0xff] }
  0x29   :  { %571 = vmatprep.subr.bf16.mxu0 %v2306_v46  ;;  %v1388_v46 = vld [vmem:[%s3614_s1 + $0x128] sm:$0xff] }
  0x2a   :  { %343 = vmatpush1.bf16.msra.mxu1 %v2290_v42  ;;  %v1423_v42 = vpack.c.bf16 %v1386_v39, %v1385_v38  ;;  %v1424_v48 = vpack.c.bf16 %v1388_v46, %v1387_v45  ;;  %v1377_v38 = vld [vmem:[%s3614_s1 + $0xd0] sm:$0xff]  ;;  %v1378_v39 = vld [vmem:[%s3614_s1 + $0xd8] sm:$0xff]  ;;  %v1379_v45 = vld [vmem:[%s3614_s1 + $0xe0] sm:$0xff] }
  0x2b   :  { %344 = vmatprep.subr.bf16.mxu1 %v2350_v0  ;;  %v1380_v46 = vld [vmem:[%s3614_s1 + $0xe8] sm:$0xff] }
  0x2c   :  { %572 = vmatpush1.bf16.msra.mxu0 %v2304_v47  ;;  %v1408_v47 = vpack.c.bf16 %v1356_v44, %v1355_v41  ;;  %v1419_v41 = vpack.c.bf16 %v1378_v39, %v1377_v38 }
  0x2d   :  { %573 = vmatprep.subr.bf16.mxu0 %v2312_v49  ;;  %v1357_v49 = vld [vmem:[%s3614_s1 + $0x30] sm:$0xff] }
  0x2e   :  { %345 = vmatpush1.bf16.msra.mxu1 %v280_v50  ;;  %v1358_v50 = vld [vmem:[%s3614_s1 + $0x38] sm:$0xff] }
  0x2f   :  { %608 = vmatprep.subr.bf16.mxu1 %v2297_v51  ;;  %v1409_v51 = vpack.c.bf16 %v1358_v50, %v1357_v49  ;;  %v1404_v49 = vld [vmem:[%s3614_s1 + $0x1a8] sm:$0xff] }
  0x30   :  { %574 = vmatpush1.bf16.msra.mxu0 %v2310_v53  ;;  %v1360_v53 = vld [vmem:[%s3614_s1 + $0x48] sm:$0xff] }
  0x31   :  { %355 = vmatmul.mubr.bf16.vlgmr.msra.gmra.mrb[0].mxu1 %v51_v52  ;;  %575 = vmatprep.subr.bf16.mxu0 %v2318_v62  ;;  %v1359_v52 = vld [vmem:[%s3614_s1 + $0x40] sm:$0xff]  ;;  %v1366_v62 = vld [vmem:[%s3614_s1 + $0x78] sm:$0xff] }
  0x32   :  { %609 = vmatpush1.bf16.msra.mxu1 %v2295_v54  ;;  %640 = vmatprep.mubr.bf16.mxu1 %v2350_v0  ;;  %v1410_v54 = vpack.c.bf16 %v1360_v53, %v1359_v52  ;;  %v1382_v52 = vld [vmem:[%s3614_s1 + $0xf8] sm:$0xff]  ;;  %v1405_v53 = vld [vmem:[%s3614_s1 + $0x1b0] sm:$0xff] }
  0x33   :  { %610 = vmatprep.subr.bf16.mxu1 %v2303_v55  ;;  %v1361_v55 = vld [vmem:[%s3614_s1 + $0x50] sm:$0xff] }
  0x34   :  { %576 = vmatpush1.bf16.msra.mxu0 %v2316_v61  ;;  %v1365_v61 = vld [vmem:[%s3614_s1 + $0x70] sm:$0xff] }
  0x35   :  { %577 = vmatprep.subr.bf16.mxu0 %v2324_v2  ;;  %v1390_v2 = vld [vmem:[%s3614_s1 + $0x138] sm:$0xff] }
  0x36   :  { %611 = vmatpush1.bf16.msra.mxu1 %v2301_v56  ;;  %v1362_v56 = vld [vmem:[%s3614_s1 + $0x58] sm:$0xff] }
  0x37   :  { %612 = vmatprep.subr.bf16.mxu1 %v2309_v57  ;;  %v1411_v57 = vpack.c.bf16 %v1362_v56, %v1361_v55  ;;  %v1433_v55 = vpack.c.bf16 %v1405_v53, %v1405_v53 }
  0x38   :  { %578 = vmatpush1.bf16.msra.mxu0 %v2322_v4  ;;  %v1367_v4 = vld [vmem:[%s3614_s1 + $0x80] sm:$0xff] }
  0x39   :  { %2150 = vmatprep.subr.msk.bf16.mxu0 %vm554_vm2, %v2328_v6  ;;  %v1391_v6 = vld [vmem:[%s3614_s1 + $0x140] sm:$0xff]  ;;  %v1519_v56 = vsel %vm278_vm1, %v1433_v55, 0 }
  0x3a   :  { %613 = vmatpush1.bf16.msra.mxu1 %v2307_v58  ;;  %v1363_v58 = vld [vmem:[%s3614_s1 + $0x60] sm:$0xff]  ;;  %v1426_v9 = vpack.c.bf16 %v1392_v8, %v1391_v6 }
  0x3b   :  { %614 = vmatprep.subr.bf16.mxu1 %v2315_v59  ;;  %v1364_v59 = vld [vmem:[%s3614_s1 + $0x68] sm:$0xff] }
  0x3c   :  { %580 = vmatpush1.bf16.msra.mxu0 %v556_v10  ;;  %v1369_v10 = vld [vmem:[%s3614_s1 + $0x90] sm:$0xff] }
  0x3d   :  { %1521 = vmatprep.subr.bf16.mxu0 %v2350_v0 }
  0x3e   :  { %615 = vmatpush1.bf16.msra.mxu1 %v2313_v60  ;;  %v1412_v60 = vpack.c.bf16 %v1364_v59, %v1363_v58 }
  0x3f   :  { %616 = vmatprep.subr.bf16.mxu1 %v2321_v1  ;;  %v1413_v1 = vpack.c.bf16 %v1366_v62, %v1365_v61 }
  0x42   :  { %617 = vmatpush1.bf16.msra.mxu1 %v2319_v63  ;;  %v1389_v63 = vld [vmem:[%s3614_s1 + $0x130] sm:$0xff] }
  0x43   :  { %618 = vmatprep.subr.bf16.mxu1 %v2327_v3  ;;  %v1425_v3 = vpack.c.bf16 %v1390_v2, %v1389_v63 }
  0x46   :  { %619 = vmatpush1.bf16.msra.mxu1 %v2325_v5  ;;  %v1368_v5 = vld [vmem:[%s3614_s1 + $0x88] sm:$0xff] }
  0x47   :  { %2152 = vmatprep.subr.msk.bf16.mxu1 %vm554_vm2, %v2330_v7  ;;  %v1414_v7 = vpack.c.bf16 %v1368_v5, %v1367_v4 }
  0x4a   :  { %621 = vmatpush1.bf16.msra.mxu1 %v562_v11  ;;  %v1370_v11 = vld [vmem:[%s3614_s1 + $0x98] sm:$0xff] }
  0x4b   :  { %1777 = vmatprep.subr.bf16.mxu1 %v2350_v0 }
  0xf6   :  { %v2202_v12 = vpop.f32.mrb[0].mxu0 }
  0xf7   :  { %v2203_v13 = vpop.f32.mrb[1].mxu0 }
  0xf8   :  { %v2204_v14 = vadd.f32 %v2203_v13, %v2202_v12  ;;  %v2205_v15 = vpop.f32.mrb[2].mxu0  ;;  %v1393_v12 = vld [vmem:[%s3614_s1 + $0x150] sm:$0xff]  ;;  %v1415_v13 = vpack.c.bf16 %v1370_v11, %v1369_v10 }
  0xf9   :  { %v2206_v16 = vpop.f32.mrb[3].mxu0 }
  0xfa   :  { %v317_v18 = vadd.f32 %v2204_v14, %v108_v17  ;;  %v1394_v14 = vld [vmem:[%s3614_s1 + $0x158] sm:$0xff]  ;;  %v1371_v16 = vld [vmem:[%s3614_s1 + $0xa0] sm:$0xff]  ;;  %v1372_v17 = vld [vmem:[%s3614_s1 + $0xa8] sm:$0xff] }
  0xfb   :  { %v1427_v15 = vpack.c.bf16 %v1394_v14, %v1393_v12 }
 0x104   :  { %v356_v20 = vpop.f32.mrb[0].mxu1 }
 0x105   :  { %v357_v22 = vadd.f32 %v356_v20, %v317_v18  ;;  %v358_v25 = vpop.f32.mrb[1].mxu1  ;;  %v1395_v18 = vld [vmem:[%s3614_s1 + $0x160] sm:$0xff]  ;;  %v1416_v20 = vpack.c.bf16 %v1372_v17, %v1371_v16 }
 0x106   :  { %v359_v30 = vpop.f32.mrb[2].mxu1  ;;  %v1373_v25 = vld [vmem:[%s3614_s1 + $0xb0] sm:$0xff] }
 0x107   :  { %v362_v31 = vmax.f32 %v357_v22, 0.0  ;;  %v360_v32 = vpop.f32.mrb[3].mxu1  ;;  %v1428_v22 = vpack.c.bf16 %v1396_v21, %v1395_v18  ;;  %v1417_v29 = vpack.c.bf16 %v1374_v26, %v1373_v25  ;;  %v1398_v30 = vld [vmem:[%s3614_s1 + $0x178] sm:$0xff]  ;;  %v673_v18 = vld [vmem:[%s3616_s6] sm:$0xff]  ;;  %v674_v21 = vld [vmem:[%s3616_s6 + $0x8] sm:$0xff] }
 0x108   :  { %v1375_v32 = vld [vmem:[%s3614_s1 + $0xc0] sm:$0xff]  ;;  %v679_v26 = vld [vmem:[%s3616_s6 + $0x30] sm:$0xff] }
 0x109   :  { %v363_v36 = vpack.c.bf16 %v362_v31, %v362_v31  ;;  %v1429_v31 = vpack.c.bf16 %v1398_v30, %v1397_v28  ;;  %v677_v25 = vld [vmem:[%s3616_s6 + $0x20] sm:$0xff]  ;;  %v784_v30 = vunpack.c.h.bf16 %v673_v18 }
 0x10a   :  { %v792_v39 = vunpack.c.h.bf16 %v677_v25 }
 0x10b   :  { %2151 = vmatmul.mubr.msk.bf16.vlgmr.msra.gmra.mrb[4].mxu0 %vm550_vm3, %v363_v36  ;;  %2153 = vmatmul.mubr.msk.bf16.vlgmr.msra.gmra.mrb[4].mxu1 %vm550_vm3, %v363_v36  ;;  %v1400_v36 = vld [vmem:[%s3614_s1 + $0x188] sm:$0xff] }
 0x10c   :  { %1522 = vmatpush1.bf16.msra.mxu0 %v1406_v33  ;;  %1778 = vmatpush1.bf16.msra.mxu1 %v1422_v35  ;;  %v1376_v33 = vld [vmem:[%s3614_s1 + $0xc8] sm:$0xff]  ;;  %v1430_v37 = vpack.c.bf16 %v1400_v36, %v1399_v34  ;;  %v680_v34 = vld [vmem:[%s3616_s6 + $0x38] sm:$0xff] }
 0x10d   :  { %1523 = vmatprep.subr.bf16.mxu0 %v2350_v0  ;;  %1779 = vmatprep.subr.bf16.mxu1 %v2350_v0  ;;  %v1418_v35 = vpack.c.bf16 %v1376_v33, %v1375_v32  ;;  %v785_v32 = vunpack.c.l.bf16 %v674_v21  ;;  %v678_v33 = vld [vmem:[%s3616_s6 + $0x28] sm:$0xff] }
 0x110   :  { %1524 = vmatpush1.bf16.msra.mxu0 %v1407_v40  ;;  %1780 = vmatpush1.bf16.msra.mxu1 %v1423_v42  ;;  %v1401_v40 = vld [vmem:[%s3614_s1 + $0x190] sm:$0xff]  ;;  %v1402_v42 = vld [vmem:[%s3614_s1 + $0x198] sm:$0xff] }
 0x111   :  { %1525 = vmatprep.subr.bf16.mxu0 %v2350_v0  ;;  %1781 = vmatprep.subr.bf16.mxu1 %v2350_v0  ;;  %v1431_v44 = vpack.c.bf16 %v1402_v42, %v1401_v40  ;;  %v786_v42 = vunpack.c.h.bf16 %v674_v21  ;;  %v685_v21 = vld [vmem:[%s3616_s6 + $0x60] sm:$0xff] }
 0x114   :  { %1526 = vmatpush1.bf16.msra.mxu0 %v1408_v47  ;;  %1782 = vmatpush1.bf16.msra.mxu1 %v1424_v48  ;;  %v1403_v47 = vld [vmem:[%s3614_s1 + $0x1a0] sm:$0xff]  ;;  %v1420_v48 = vpack.c.bf16 %v1380_v46, %v1379_v45  ;;  %v796_v45 = vunpack.c.h.bf16 %v679_v26 }
 0x115   :  { %1527 = vmatprep.subr.bf16.mxu0 %v2350_v0  ;;  %1783 = vmatprep.subr.bf16.mxu1 %v2350_v0  ;;  %v1432_v50 = vpack.c.bf16 %v1404_v49, %v1403_v47  ;;  %v798_v49 = vunpack.c.h.bf16 %v680_v34 }
 0x118   :  { %1528 = vmatpush1.bf16.msra.mxu0 %v1409_v51  ;;  %1784 = vmatpush1.bf16.msra.mxu1 %v1425_v3  ;;  %v1381_v51 = vld [vmem:[%s3614_s1 + $0xf0] sm:$0xff] }
 0x119   :  { %1529 = vmatprep.subr.bf16.mxu0 %v2350_v0  ;;  %1785 = vmatprep.subr.bf16.mxu1 %v2350_v0 }
 0x11c   :  { %1530 = vmatpush1.bf16.msra.mxu0 %v1410_v54  ;;  %1786 = vmatpush1.bf16.msra.mxu1 %v1426_v9  ;;  %v1421_v54 = vpack.c.bf16 %v1382_v52, %v1381_v51 }
 0x11d   :  { %1531 = vmatprep.subr.bf16.mxu0 %v2350_v0  ;;  %1787 = vmatprep.subr.bf16.mxu1 %v2350_v0 }
 0x120   :  { %1532 = vmatpush1.bf16.msra.mxu0 %v1411_v57  ;;  %1788 = vmatpush1.bf16.msra.mxu1 %v1427_v15  ;;  %v392_v57 = vld [vmem:[%s3615_s5] sm:$0xf] }
 0x121   :  { %1533 = vmatprep.subr.bf16.mxu0 %v2350_v0  ;;  %1789 = vmatprep.subr.bf16.mxu1 %v2350_v0  ;;  %v533_v58 = vrot.slane %v392_v57, %v2469_v27  ;;  %v541_v59 = vrot.slane %v392_v57, %v39_v43  ;;  %v545_v61 = vrot.slane %v392_v57, %v43_v24 }
 0x124   :  { %1534 = vmatpush1.bf16.msra.mxu0 %v1412_v60  ;;  %1790 = vmatpush1.bf16.msra.mxu1 %v1428_v22  ;;  %v537_v60 = vrot.slane %v392_v57, %v35_v23  ;;  %v676_v22 = vld [vmem:[%s3616_s6 + $0x18] sm:$0xff] }
 0x125   :  { %1535 = vmatprep.subr.bf16.mxu0 %v2350_v0  ;;  %1791 = vmatprep.subr.bf16.mxu1 %v2350_v0  ;;  %v789_v38 = vunpack.c.l.bf16 %v676_v22 }
 0x128   :  { %1536 = vmatpush1.bf16.msra.mxu0 %v1413_v1  ;;  %1792 = vmatpush1.bf16.msra.mxu1 %v1429_v31 }
 0x129   :  { %1537 = vmatprep.subr.bf16.mxu0 %v2350_v0  ;;  %1793 = vmatprep.subr.bf16.mxu1 %v2350_v0 }
 0x12c   :  { %1538 = vmatpush1.bf16.msra.mxu0 %v1414_v7  ;;  %1794 = vmatpush1.bf16.msra.mxu1 %v1430_v37 }
 0x12d   :  { %1539 = vmatprep.subr.bf16.mxu0 %v2350_v0  ;;  %1795 = vmatprep.subr.bf16.mxu1 %v2350_v0 }
 0x130   :  { %1540 = vmatpush1.bf16.msra.mxu0 %v1415_v13  ;;  %1796 = vmatpush1.bf16.msra.mxu1 %v1431_v44  ;;  %v790_v44 = vunpack.c.h.bf16 %v676_v22  ;;  %v687_v22 = vld [vmem:[%s3616_s6 + $0x70] sm:$0xff] }
 0x131   :  { %1541 = vmatprep.subr.bf16.mxu0 %v2350_v0  ;;  %1797 = vmatprep.subr.bf16.mxu1 %v2350_v0 }
 0x134   :  { %1542 = vmatpush1.bf16.msra.mxu0 %v1416_v20  ;;  %1798 = vmatpush1.bf16.msra.mxu1 %v1432_v50  ;;  %v675_v20 = vld [vmem:[%s3616_s6 + $0x10] sm:$0xff] }
 0x135   :  { %1543 = vmatprep.subr.bf16.mxu0 %v2350_v0  ;;  %1799 = vmatprep.subr.bf16.mxu1 %v2350_v0  ;;  %v787_v31 = vunpack.c.l.bf16 %v675_v20  ;;  %v788_v37 = vunpack.c.h.bf16 %v675_v20 }
 0x138   :  { %1544 = vmatpush1.bf16.msra.mxu0 %v1417_v29  ;;  %1800 = vmatpush1.bf16.msra.mxu1 %v1519_v56  ;;  %v783_v29 = vunpack.c.l.bf16 %v673_v18 }
 0x139   :  { %1545 = vmatprep.subr.bf16.mxu0 %v2350_v0 }
 0x13c   :  { %1546 = vmatpush1.bf16.msra.mxu0 %v1418_v35 }
 0x13d   :  { %1547 = vmatprep.subr.bf16.mxu0 %v2350_v0 }
 0x140   :  { %1548 = vmatpush1.bf16.msra.mxu0 %v1419_v41 }
 0x141   :  { %1549 = vmatprep.subr.bf16.mxu0 %v2350_v0 }
 0x144   :  { %1550 = vmatpush1.bf16.msra.mxu0 %v1420_v48  ;;  %v794_v48 = vunpack.c.h.bf16 %v678_v33 }
 0x145   :  { %1551 = vmatprep.subr.bf16.mxu0 %v2350_v0 }
 0x148   :  { %1552 = vmatpush1.bf16.msra.mxu0 %v1421_v54 }
 0x1de   :  { %v601_v0 = vpop.f32.mrb[4].mxu0  ;;  %v642_v62 = vpop.f32.mrb[4].mxu1 }
 0x1df   :  { %v602_v63 = vadd.f32 %v601_v0, %v533_v58  ;;  %v643_v1 = vadd.f32 %v642_v62, %v541_v59  ;;  %v603_v2 = vpop.f32.mrb[5].mxu0  ;;  %v644_v3 = vpop.f32.mrb[5].mxu1  ;;  %v683_v0 = vld [vmem:[%s3616_s6 + $0x50] sm:$0xff] }
 0x1e0   :  { %v604_v4 = vadd.f32 %v603_v2, %v537_v60  ;;  %v645_v5 = vadd.f32 %v644_v3, %v545_v61  ;;  %v605_v6 = vpop.f32.mrb[6].mxu0  ;;  %v646_v7 = vpop.f32.mrb[6].mxu1  ;;  %v791_v60 = vunpack.c.l.bf16 %v677_v25  ;;  %v681_v61 = vld [vmem:[%s3616_s6 + $0x40] sm:$0xff]  ;;  %v795_v2 = vunpack.c.l.bf16 %v679_v26  ;;  %v682_v3 = vld [vmem:[%s3616_s6 + $0x48] sm:$0xff] }
 0x1e1   :  { %v2154_v8 = vmul.f32 -1.442695, %v602_v63  ;;  %v2156_v9 = vmul.f32 -1.442695, %v643_v1  ;;  %v606_v10 = vpop.f32.mrb[7].mxu0  ;;  %v647_v43 = vpop.f32.mrb[7].mxu1  ;;  %v793_v7 = vunpack.c.l.bf16 %v678_v33  ;;  %v799_v25 = vunpack.c.l.bf16 %v681_v61 }
 0x1e2   :  { %v2155_v11 = vmul.f32 -1.442695, %v604_v4  ;;  %v2157_v12 = vmul.f32 -1.442695, %v645_v5  ;;  %v684_v4 = vld [vmem:[%s3616_s6 + $0x58] sm:$0xff]  ;;  %v800_v43 = vunpack.c.h.bf16 %v681_v61  ;;  %v686_v26 = vld [vmem:[%s3616_s6 + $0x68] sm:$0xff] }
 0x1e3   :  { %2334 = vpow2.f32 %v2154_v8  ;;  %v797_v8 = vunpack.c.l.bf16 %v680_v34 }
 0x1e4   :  { %2336 = vpow2.f32 %v2156_v9 }
 0x1e5   :  { %2338 = vpow2.f32 %v2155_v11  ;;  %v804_v11 = vunpack.c.h.bf16 %v683_v0 }
 0x1e6   :  { %2340 = vpow2.f32 %v2157_v12 }
 0x1ed   :  { %v2335_v19 = vpop.eup %2334 }
 0x1ee   :  { %v2337_v23 = vpop.eup %2336  ;;  %v661_v24 = vadd.f32 1.0, %v2335_v19  ;;  %v802_v19 = vunpack.c.h.bf16 %v682_v3 }
 0x1ef   :  { %v2339_v13 = vpop.eup %2338  ;;  %v663_v14 = vadd.f32 1.0, %v2337_v23  ;;  %v806_v23 = vunpack.c.h.bf16 %v684_v4 }
 0x1f0   :  { %v2341_v15 = vpop.eup %2340  ;;  %2342 = vrcp.f32 %v661_v24  ;;  %v662_v16 = vadd.f32 1.0, %v2339_v13 }
 0x1f1   :  { %2344 = vrcp.f32 %v663_v14  ;;  %v664_v17 = vadd.f32 1.0, %v2341_v15 }
 0x1f2   :  { %2346 = vrcp.f32 %v662_v16 }
 0x1f3   :  { %2348 = vrcp.f32 %v664_v17 }
 0x1fa   :  { %v2343_v28 = vpop.eup %2342 }
 0x1fb   :  { %v2345_v35 = vpop.eup %2344  ;;  %v2825_v36 = vrot.slane %v2343_v28, %v2469_v27  ;;  %v688_v28 = vld [vmem:[%s3616_s6 + $0x78] sm:$0xff] }
 0x1fc   :  { %v2347_v40 = vpop.eup %2346  ;;  %v2828_v41 = vrot.slane %v2345_v35, %v2469_v27  ;;  %v808_v35 = vunpack.c.h.bf16 %v685_v21 }
 0x1fd   :  { %v2349_v46 = vpop.eup %2348  ;;  %v2831_v47 = vrot.slane %v2347_v40, %v2469_v27  ;;  %v1019_v51 = vmul.f32 %v2825_v36, %v783_v29  ;;  %v1023_v52 = vmul.f32 %v2825_v36, %v787_v31  ;;  %v1027_v24 = vmul.f32 %v2825_v36, %v791_v60 }
 0x1fe   :  { %v2834_v50 = vrot.slane %v2349_v46, %v2469_v27  ;;  %v1021_v53 = vmul.f32 %v2828_v41, %v785_v32  ;;  %v1025_v56 = vmul.f32 %v2828_v41, %v789_v38  ;;  %v1031_v13 = vmul.f32 %v2825_v36, %v795_v2 }
 0x1ff   :  { %v1020_v54 = vmul.f32 %v2831_v47, %v784_v30  ;;  %v1024_v55 = vmul.f32 %v2831_v47, %v788_v37  ;;  %v1028_v57 = vmul.f32 %v2831_v47, %v792_v39  ;;  %v1032_v27 = vmul.f32 %v2831_v47, %v796_v45 }
 0x200   :  { %v1022_v58 = vmul.f32 %v2834_v50, %v786_v42  ;;  %v1026_v59 = vmul.f32 %v2834_v50, %v790_v44  ;;  %v1030_v63 = vmul.f32 %v2834_v50, %v794_v48  ;;  %v1034_v1 = vmul.f32 %v2834_v50, %v798_v49 }
 0x201   :  { %v1240_v62 = vpack.c.bf16 %v1024_v55, %v1020_v54  ;;  %v1239_v6 = vpack.c.bf16 %v1023_v52, %v1019_v51  ;;  %v1241_v9 = vpack.c.bf16 %v1025_v56, %v1021_v53  ;;  %v1244_v10 = vpack.c.bf16 %v1032_v27, %v1028_v57  ;;  %v689_v53 = vld [vmem:[%s3616_s6 + $0x80] sm:$0xff]  ;;  %v691_v54 = vld [vmem:[%s3616_s6 + $0x90] sm:$0xff]  ;;  %v690_v56 = vld [vmem:[%s3616_s6 + $0x88] sm:$0xff] }
 0x202   :  { %v1242_v5 = vpack.c.bf16 %v1026_v59, %v1022_v58  ;;  %v1246_v12 = vpack.c.bf16 %v1034_v1, %v1030_v63  ;;  %v1029_v14 = vmul.f32 %v2828_v41, %v793_v7  ;;  %v1033_v15 = vmul.f32 %v2828_v41, %v797_v8  ;;  %v692_v57 = vld [vmem:[%s3616_s6 + $0x98] sm:$0xff] }
 0x203   :  { %1553 = vmatprep.mubr.bf16.mxu0 %v1240_v62  ;;  %v1036_v16 = vmul.f32 %v2831_v47, %v800_v43  ;;  %v1040_v17 = vmul.f32 %v2831_v47, %v804_v11  ;;  %v1038_v18 = vmul.f32 %v2834_v50, %v802_v19  ;;  %v1042_v20 = vmul.f32 %v2834_v50, %v806_v23  ;;  %v693_v11 = vld [vmem:[%s3616_s6 + $0xa0] sm:$0xff]  ;;  %v694_v23 = vld [vmem:[%s3616_s6 + $0xa8] sm:$0xff] }
 0x204   :  { %2158 = vmatprep.mubr.msk.bf16.mxu1 %vm274_vm0, %v1242_v5  ;;  %1554 = vmatmul.mubr.bf16.vlgmr.msra.gmra.mrb[8].mxu0 %v1239_v6  ;;  %v1243_v29 = vpack.c.bf16 %v1031_v13, %v1027_v24  ;;  %v803_v30 = vunpack.c.l.bf16 %v683_v0  ;;  %v801_v31 = vunpack.c.l.bf16 %v682_v3  ;;  %v805_v32 = vunpack.c.l.bf16 %v684_v4  ;;  %v696_v24 = vld [vmem:[%s3616_s6 + $0xb8] sm:$0xff] }
 0x205   :  { %1810 = vmatmul.mubr.bf16.vlgmr.msra.gmra.mrb[8].mxu1 %v1241_v9  ;;  %1561 = vmatprep.mubr.bf16.mxu0 %v1244_v10  ;;  %v1245_v33 = vpack.c.bf16 %v1033_v15, %v1029_v14  ;;  %v1248_v34 = vpack.c.bf16 %v1040_v17, %v1036_v16  ;;  %v812_v37 = vunpack.c.h.bf16 %v687_v22  ;;  %v1250_v38 = vpack.c.bf16 %v1042_v20, %v1038_v18 }
 0x206   :  { %2159 = vmatprep.mubr.msk.bf16.mxu1 %vm274_vm0, %v1246_v12  ;;  %v810_v39 = vunpack.c.h.bf16 %v686_v26  ;;  %v814_v40 = vunpack.c.h.bf16 %v688_v28  ;;  %v1035_v42 = vmul.f32 %v2825_v36, %v799_v25  ;;  %v1039_v44 = vmul.f32 %v2825_v36, %v803_v30  ;;  %v695_v12 = vld [vmem:[%s3616_s6 + $0xb0] sm:$0xff] }
 0x207   :  { %v1037_v45 = vmul.f32 %v2828_v41, %v801_v31  ;;  %v1041_v46 = vmul.f32 %v2828_v41, %v805_v32  ;;  %v1044_v48 = vmul.f32 %v2831_v47, %v808_v35  ;;  %v1048_v49 = vmul.f32 %v2831_v47, %v812_v37  ;;  %v697_v37 = vld [vmem:[%s3616_s6 + $0xc0] sm:$0xff] }
 0x208   :  { %v1046_v51 = vmul.f32 %v2834_v50, %v810_v39  ;;  %v1050_v52 = vmul.f32 %v2834_v50, %v814_v40  ;;  %v807_v55 = vunpack.c.l.bf16 %v685_v21  ;;  %v1247_v58 = vpack.c.bf16 %v1039_v44, %v1035_v42  ;;  %v698_v40 = vld [vmem:[%s3616_s6 + $0xc8] sm:$0xff]  ;;  %v700_v42 = vld [vmem:[%s3616_s6 + $0xd8] sm:$0xff] }
 0x209   :  { %v811_v59 = vunpack.c.l.bf16 %v687_v22  ;;  %v809_v27 = vunpack.c.l.bf16 %v686_v26  ;;  %v813_v60 = vunpack.c.l.bf16 %v688_v28  ;;  %v1249_v61 = vpack.c.bf16 %v1041_v46, %v1037_v45 }
 0x20a   :  { %v1252_v0 = vpack.c.bf16 %v1048_v49, %v1044_v48  ;;  %v816_v62 = vunpack.c.h.bf16 %v689_v53  ;;  %v820_v63 = vunpack.c.h.bf16 %v691_v54  ;;  %v1254_v1 = vpack.c.bf16 %v1050_v52, %v1046_v51 }
 0x20b   :  { %v818_v2 = vunpack.c.h.bf16 %v690_v56  ;;  %v822_v3 = vunpack.c.h.bf16 %v692_v57  ;;  %v1043_v4 = vmul.f32 %v2825_v36, %v807_v55  ;;  %v1047_v5 = vmul.f32 %v2825_v36, %v811_v59 }
 0x20c   :  { %1562 = vmatmul.mubr.bf16.gmra.mrb[12].mxu0 %v1243_v29  ;;  %v1045_v6 = vmul.f32 %v2828_v41, %v809_v27  ;;  %v1049_v7 = vmul.f32 %v2828_v41, %v813_v60  ;;  %v1052_v8 = vmul.f32 %v2831_v47, %v816_v62  ;;  %v1056_v9 = vmul.f32 %v2831_v47, %v820_v63  ;;  %v701_v63 = vld [vmem:[%s3616_s6 + $0xe0] sm:$0xff] }
 0x20d   :  { %1818 = vmatmul.mubr.bf16.gmra.mrb[12].mxu1 %v1245_v33  ;;  %1569 = vmatprep.mubr.bf16.mxu0 %v1248_v34  ;;  %v1054_v10 = vmul.f32 %v2834_v50, %v818_v2  ;;  %v1058_v43 = vmul.f32 %v2834_v50, %v822_v3  ;;  %v815_v19 = vunpack.c.l.bf16 %v689_v53  ;;  %v1251_v13 = vpack.c.bf16 %v1047_v5, %v1043_v4  ;;  %v702_v3 = vld [vmem:[%s3616_s6 + $0xe8] sm:$0xff]  ;;  %v704_v4 = vld [vmem:[%s3616_s6 + $0xf8] sm:$0xff] }
 0x20e   :  { %2160 = vmatprep.mubr.msk.bf16.mxu1 %vm274_vm0, %v1250_v38  ;;  %v819_v14 = vunpack.c.l.bf16 %v691_v54  ;;  %v817_v15 = vunpack.c.l.bf16 %v690_v56  ;;  %v821_v16 = vunpack.c.l.bf16 %v692_v57  ;;  %v1253_v17 = vpack.c.bf16 %v1049_v7, %v1045_v6  ;;  %v699_v38 = vld [vmem:[%s3616_s6 + $0xd0] sm:$0xff] }
 0x20f   :  { %v1256_v18 = vpack.c.bf16 %v1056_v9, %v1052_v8  ;;  %v824_v20 = vunpack.c.h.bf16 %v693_v11  ;;  %v828_v21 = vunpack.c.h.bf16 %v695_v12  ;;  %v1258_v22 = vpack.c.bf16 %v1058_v43, %v1054_v10 }
 0x210   :  { %v826_v25 = vunpack.c.h.bf16 %v694_v23  ;;  %v830_v26 = vunpack.c.h.bf16 %v696_v24  ;;  %v1051_v28 = vmul.f32 %v2825_v36, %v815_v19  ;;  %v1055_v29 = vmul.f32 %v2825_v36, %v819_v14 }
 0x211   :  { %v1053_v30 = vmul.f32 %v2828_v41, %v817_v15  ;;  %v1057_v31 = vmul.f32 %v2828_v41, %v821_v16  ;;  %v1060_v32 = vmul.f32 %v2831_v47, %v824_v20  ;;  %v1064_v33 = vmul.f32 %v2831_v47, %v828_v21  ;;  %v705_v21 = vld [vmem:[%s3616_s6 + $0x100] sm:$0xff] }
 0x212   :  { %v1062_v34 = vmul.f32 %v2834_v50, %v826_v25  ;;  %v1066_v35 = vmul.f32 %v2834_v50, %v830_v26  ;;  %v823_v39 = vunpack.c.l.bf16 %v693_v11  ;;  %v1255_v44 = vpack.c.bf16 %v1055_v29, %v1051_v28  ;;  %v706_v26 = vld [vmem:[%s3616_s6 + $0x108] sm:$0xff]  ;;  %v708_v28 = vld [vmem:[%s3616_s6 + $0x118] sm:$0xff] }
 0x213   :  { %v827_v45 = vunpack.c.l.bf16 %v695_v12  ;;  %v825_v46 = vunpack.c.l.bf16 %v694_v23  ;;  %v829_v48 = vunpack.c.l.bf16 %v696_v24  ;;  %v1257_v49 = vpack.c.bf16 %v1057_v31, %v1053_v30 }
 0x214   :  { %1570 = vmatmul.mubr.bf16.gmra.mrb[16].mxu0 %v1247_v58  ;;  %v1260_v51 = vpack.c.bf16 %v1064_v33, %v1060_v32  ;;  %v832_v52 = vunpack.c.h.bf16 %v697_v37  ;;  %v836_v53 = vunpack.c.h.bf16 %v699_v38  ;;  %v1262_v54 = vpack.c.bf16 %v1066_v35, %v1062_v34 }
 0x215   :  { %1826 = vmatmul.mubr.bf16.gmra.mrb[16].mxu1 %v1249_v61  ;;  %1577 = vmatprep.mubr.bf16.mxu0 %v1252_v0  ;;  %v834_v55 = vunpack.c.h.bf16 %v698_v40  ;;  %v838_v56 = vunpack.c.h.bf16 %v700_v42  ;;  %v1059_v57 = vmul.f32 %v2825_v36, %v823_v39  ;;  %v1063_v58 = vmul.f32 %v2825_v36, %v827_v45 }
 0x216   :  { %2161 = vmatprep.mubr.msk.bf16.mxu1 %vm274_vm0, %v1254_v1  ;;  %v1061_v59 = vmul.f32 %v2828_v41, %v825_v46  ;;  %v1065_v27 = vmul.f32 %v2828_v41, %v829_v48  ;;  %v1068_v60 = vmul.f32 %v2831_v47, %v832_v52  ;;  %v1072_v61 = vmul.f32 %v2831_v47, %v836_v53  ;;  %v703_v1 = vld [vmem:[%s3616_s6 + $0xf0] sm:$0xff]  ;;  %v709_v53 = vld [vmem:[%s3616_s6 + $0x120] sm:$0xff] }
 0x217   :  { %v1070_v0 = vmul.f32 %v2834_v50, %v834_v55  ;;  %v1074_v62 = vmul.f32 %v2834_v50, %v838_v56  ;;  %v831_v2 = vunpack.c.l.bf16 %v697_v37  ;;  %v1259_v5 = vpack.c.bf16 %v1063_v58, %v1059_v57  ;;  %v710_v56 = vld [vmem:[%s3616_s6 + $0x128] sm:$0xff]  ;;  %v712_v57 = vld [vmem:[%s3616_s6 + $0x138] sm:$0xff] }
 0x218   :  { %v835_v6 = vunpack.c.l.bf16 %v699_v38  ;;  %v833_v7 = vunpack.c.l.bf16 %v698_v40  ;;  %v837_v8 = vunpack.c.l.bf16 %v700_v42  ;;  %v1261_v9 = vpack.c.bf16 %v1065_v27, %v1061_v59 }
 0x219   :  { %v1264_v10 = vpack.c.bf16 %v1072_v61, %v1068_v60  ;;  %v840_v43 = vunpack.c.h.bf16 %v701_v63  ;;  %v844_v11 = vunpack.c.h.bf16 %v703_v1  ;;  %v1266_v12 = vpack.c.bf16 %v1074_v62, %v1070_v0 }
 0x21a   :  { %v842_v19 = vunpack.c.h.bf16 %v702_v3  ;;  %v846_v23 = vunpack.c.h.bf16 %v704_v4  ;;  %v1067_v24 = vmul.f32 %v2825_v36, %v831_v2  ;;  %v1069_v14 = vmul.f32 %v2828_v41, %v833_v7 }
 0x21b   :  { %v1073_v15 = vmul.f32 %v2828_v41, %v837_v8  ;;  %v1076_v16 = vmul.f32 %v2831_v47, %v840_v43  ;;  %v839_v25 = vunpack.c.l.bf16 %v701_v63  ;;  %v843_v30 = vunpack.c.l.bf16 %v703_v1 }
 0x21c   :  { %1578 = vmatmul.mubr.bf16.gmra.mrb[20].mxu0 %v1251_v13  ;;  %v1071_v13 = vmul.f32 %v2825_v36, %v835_v6  ;;  %v1082_v20 = vmul.f32 %v2834_v50, %v846_v23  ;;  %v841_v31 = vunpack.c.l.bf16 %v702_v3  ;;  %v845_v32 = vunpack.c.l.bf16 %v704_v4  ;;  %v714_v23 = vld [vmem:[%s3616_s6 + $0x148] sm:$0xff] }
 0x21d   :  { %1834 = vmatmul.mubr.bf16.gmra.mrb[20].mxu1 %v1253_v17  ;;  %1585 = vmatprep.mubr.bf16.mxu0 %v1256_v18  ;;  %v1080_v17 = vmul.f32 %v2831_v47, %v844_v11  ;;  %v1078_v18 = vmul.f32 %v2834_v50, %v842_v19  ;;  %v1265_v33 = vpack.c.bf16 %v1073_v15, %v1069_v14  ;;  %v848_v35 = vunpack.c.h.bf16 %v705_v21  ;;  %v713_v11 = vld [vmem:[%s3616_s6 + $0x140] sm:$0xff] }
 0x21e   :  { %2162 = vmatprep.mubr.msk.bf16.mxu1 %vm274_vm0, %v1258_v22  ;;  %v707_v22 = vld [vmem:[%s3616_s6 + $0x110] sm:$0xff]  ;;  %v1263_v29 = vpack.c.bf16 %v1071_v13, %v1067_v24  ;;  %v850_v39 = vunpack.c.h.bf16 %v706_v26  ;;  %v854_v40 = vunpack.c.h.bf16 %v708_v28  ;;  %v1075_v42 = vmul.f32 %v2825_v36, %v839_v25  ;;  %v716_v24 = vld [vmem:[%s3616_s6 + $0x158] sm:$0xff] }
 0x21f   :  { %v1268_v34 = vpack.c.bf16 %v1080_v17, %v1076_v16  ;;  %v852_v37 = vunpack.c.h.bf16 %v707_v22  ;;  %v1270_v38 = vpack.c.bf16 %v1082_v20, %v1078_v18  ;;  %v1077_v45 = vmul.f32 %v2828_v41, %v841_v31 }
 0x220   :  { %v1081_v46 = vmul.f32 %v2828_v41, %v845_v32  ;;  %v1084_v48 = vmul.f32 %v2831_v47, %v848_v35  ;;  %v1090_v52 = vmul.f32 %v2834_v50, %v854_v40  ;;  %v847_v55 = vunpack.c.l.bf16 %v705_v21  ;;  %v718_v40 = vld [vmem:[%s3616_s6 + $0x168] sm:$0xff] }
 0x221   :  { %v851_v59 = vunpack.c.l.bf16 %v707_v22  ;;  %v849_v27 = vunpack.c.l.bf16 %v706_v26  ;;  %v853_v60 = vunpack.c.l.bf16 %v708_v28  ;;  %v856_v62 = vunpack.c.h.bf16 %v709_v53 }
 0x222   :  { %v1269_v61 = vpack.c.bf16 %v1081_v46, %v1077_v45  ;;  %v858_v2 = vunpack.c.h.bf16 %v710_v56  ;;  %v862_v3 = vunpack.c.h.bf16 %v712_v57  ;;  %v1083_v4 = vmul.f32 %v2825_v36, %v847_v55 }
 0x223   :  { %v1085_v6 = vmul.f32 %v2828_v41, %v849_v27  ;;  %v1089_v7 = vmul.f32 %v2828_v41, %v853_v60  ;;  %v1092_v8 = vmul.f32 %v2831_v47, %v856_v62  ;;  %v855_v19 = vunpack.c.l.bf16 %v709_v53 }
 0x224   :  { %1586 = vmatmul.mubr.bf16.gmra.mrb[24].mxu0 %v1255_v44  ;;  %v1079_v44 = vmul.f32 %v2825_v36, %v843_v30  ;;  %v1098_v43 = vmul.f32 %v2834_v50, %v862_v3  ;;  %v857_v15 = vunpack.c.l.bf16 %v710_v56  ;;  %v861_v16 = vunpack.c.l.bf16 %v712_v57  ;;  %v722_v3 = vld [vmem:[%s3616_s6 + $0x188] sm:$0xff] }
 0x225   :  { %1842 = vmatmul.mubr.bf16.gmra.mrb[24].mxu1 %v1257_v49  ;;  %1593 = vmatprep.mubr.bf16.mxu0 %v1260_v51  ;;  %v1088_v49 = vmul.f32 %v2831_v47, %v852_v37  ;;  %v1086_v51 = vmul.f32 %v2834_v50, %v850_v39  ;;  %v1273_v17 = vpack.c.bf16 %v1089_v7, %v1085_v6  ;;  %v864_v20 = vunpack.c.h.bf16 %v713_v11  ;;  %v717_v37 = vld [vmem:[%s3616_s6 + $0x160] sm:$0xff] }
 0x226   :  { %2163 = vmatprep.mubr.msk.bf16.mxu1 %vm274_vm0, %v1262_v54  ;;  %v711_v54 = vld [vmem:[%s3616_s6 + $0x130] sm:$0xff]  ;;  %v1267_v58 = vpack.c.bf16 %v1079_v44, %v1075_v42  ;;  %v866_v25 = vunpack.c.h.bf16 %v714_v23  ;;  %v870_v26 = vunpack.c.h.bf16 %v716_v24  ;;  %v1091_v28 = vmul.f32 %v2825_v36, %v855_v19  ;;  %v720_v42 = vld [vmem:[%s3616_s6 + $0x178] sm:$0xff] }
 0x227   :  { %v1272_v0 = vpack.c.bf16 %v1088_v49, %v1084_v48  ;;  %v860_v63 = vunpack.c.h.bf16 %v711_v54  ;;  %v1274_v1 = vpack.c.bf16 %v1090_v52, %v1086_v51  ;;  %v859_v14 = vunpack.c.l.bf16 %v711_v54 }
 0x228   :  { %v1093_v30 = vmul.f32 %v2828_v41, %v857_v15  ;;  %v1097_v31 = vmul.f32 %v2828_v41, %v861_v16  ;;  %v1100_v32 = vmul.f32 %v2831_v47, %v864_v20  ;;  %v1106_v35 = vmul.f32 %v2834_v50, %v870_v26  ;;  %v726_v26 = vld [vmem:[%s3616_s6 + $0x1a8] sm:$0xff] }
 0x229   :  { %v863_v39 = vunpack.c.l.bf16 %v713_v11  ;;  %v865_v46 = vunpack.c.l.bf16 %v714_v23  ;;  %v869_v48 = vunpack.c.l.bf16 %v716_v24  ;;  %v872_v52 = vunpack.c.h.bf16 %v717_v37 }
 0x22a   :  { %v1277_v49 = vpack.c.bf16 %v1097_v31, %v1093_v30  ;;  %v874_v55 = vunpack.c.h.bf16 %v718_v40  ;;  %v878_v56 = vunpack.c.h.bf16 %v720_v42  ;;  %v873_v7 = vunpack.c.l.bf16 %v718_v40 }
 0x22b   :  { %v1099_v57 = vmul.f32 %v2825_v36, %v863_v39  ;;  %v1105_v27 = vmul.f32 %v2828_v41, %v869_v48  ;;  %v1108_v60 = vmul.f32 %v2831_v47, %v872_v52  ;;  %v882_v19 = vunpack.c.h.bf16 %v722_v3 }
 0x22c   :  { %1594 = vmatmul.mubr.bf16.gmra.mrb[28].mxu0 %v1259_v5  ;;  %v1087_v5 = vmul.f32 %v2825_v36, %v851_v59  ;;  %v1101_v59 = vmul.f32 %v2828_v41, %v865_v46  ;;  %v1114_v62 = vmul.f32 %v2834_v50, %v878_v56  ;;  %v881_v31 = vunpack.c.l.bf16 %v722_v3  ;;  %v730_v56 = vld [vmem:[%s3616_s6 + $0x1c8] sm:$0xff] }
 0x22d   :  { %1850 = vmatmul.mubr.bf16.gmra.mrb[28].mxu1 %v1261_v9  ;;  %1601 = vmatprep.mubr.bf16.mxu0 %v1264_v10  ;;  %v1096_v9 = vmul.f32 %v2831_v47, %v860_v63  ;;  %v1094_v10 = vmul.f32 %v2834_v50, %v858_v2  ;;  %v721_v63 = vld [vmem:[%s3616_s6 + $0x180] sm:$0xff]  ;;  %v871_v2 = vunpack.c.l.bf16 %v717_v37  ;;  %v890_v39 = vunpack.c.h.bf16 %v726_v26 }
 0x22e   :  { %2164 = vmatprep.mubr.msk.bf16.mxu1 %vm274_vm0, %v1266_v12  ;;  %v715_v12 = vld [vmem:[%s3616_s6 + $0x150] sm:$0xff]  ;;  %v1271_v13 = vpack.c.bf16 %v1087_v5, %v1083_v4  ;;  %v724_v4 = vld [vmem:[%s3616_s6 + $0x198] sm:$0xff] }
 0x22f   :  { %v1276_v18 = vpack.c.bf16 %v1096_v9, %v1092_v8  ;;  %v868_v21 = vunpack.c.h.bf16 %v715_v12  ;;  %v1278_v22 = vpack.c.bf16 %v1098_v43, %v1094_v10  ;;  %v867_v45 = vunpack.c.l.bf16 %v715_v12 }
 0x230   :  { %v877_v8 = vunpack.c.l.bf16 %v720_v42  ;;  %v1281_v9 = vpack.c.bf16 %v1105_v27, %v1101_v59  ;;  %v880_v43 = vunpack.c.h.bf16 %v721_v63  ;;  %v886_v23 = vunpack.c.h.bf16 %v724_v4 }
 0x231   :  { %v1107_v24 = vmul.f32 %v2825_v36, %v871_v2  ;;  %v889_v27 = vunpack.c.l.bf16 %v726_v26  ;;  %v898_v2 = vunpack.c.h.bf16 %v730_v56 }
 0x232   :  { %v1113_v15 = vmul.f32 %v2828_v41, %v877_v8  ;;  %v1116_v16 = vmul.f32 %v2831_v47, %v880_v43  ;;  %v1122_v20 = vmul.f32 %v2834_v50, %v886_v23  ;;  %v734_v23 = vld [vmem:[%s3616_s6 + $0x1e8] sm:$0xff] }
 0x234   :  { %1602 = vmatmul.mubr.bf16.gmra.mrb[32].mxu0 %v1263_v29  ;;  %v1095_v29 = vmul.f32 %v2825_v36, %v859_v14  ;;  %v1109_v14 = vmul.f32 %v2828_v41, %v873_v7 }
 0x235   :  { %1858 = vmatmul.mubr.bf16.gmra.mrb[32].mxu1 %v1265_v33  ;;  %1609 = vmatprep.mubr.bf16.mxu0 %v1268_v34  ;;  %v1104_v33 = vmul.f32 %v2831_v47, %v868_v21  ;;  %v1102_v34 = vmul.f32 %v2834_v50, %v866_v25  ;;  %v725_v21 = vld [vmem:[%s3616_s6 + $0x1a0] sm:$0xff]  ;;  %v879_v25 = vunpack.c.l.bf16 %v721_v63 }
 0x236   :  { %2165 = vmatprep.mubr.msk.bf16.mxu1 %vm274_vm0, %v1270_v38  ;;  %v719_v38 = vld [vmem:[%s3616_s6 + $0x170] sm:$0xff]  ;;  %v1275_v44 = vpack.c.bf16 %v1095_v29, %v1091_v28  ;;  %v728_v28 = vld [vmem:[%s3616_s6 + $0x1b8] sm:$0xff] }
 0x237   :  { %v1280_v51 = vpack.c.bf16 %v1104_v33, %v1100_v32  ;;  %v876_v53 = vunpack.c.h.bf16 %v719_v38  ;;  %v1282_v54 = vpack.c.bf16 %v1106_v35, %v1102_v34  ;;  %v875_v6 = vunpack.c.l.bf16 %v719_v38 }
 0x238   :  { %v885_v32 = vunpack.c.l.bf16 %v724_v4  ;;  %v1285_v33 = vpack.c.bf16 %v1113_v15, %v1109_v14  ;;  %v888_v35 = vunpack.c.h.bf16 %v725_v21  ;;  %v894_v40 = vunpack.c.h.bf16 %v728_v28 }
 0x239   :  { %v1115_v42 = vmul.f32 %v2825_v36, %v879_v25  ;;  %v897_v15 = vunpack.c.l.bf16 %v730_v56  ;;  %v906_v25 = vunpack.c.h.bf16 %v734_v23 }
 0x23a   :  { %v1121_v46 = vmul.f32 %v2828_v41, %v885_v32  ;;  %v1124_v48 = vmul.f32 %v2831_v47, %v888_v35  ;;  %v1130_v52 = vmul.f32 %v2834_v50, %v894_v40  ;;  %v738_v40 = vld [vmem:[%s3616_s6 + $0x208] sm:$0xff] }
 0x23c   :  { %1610 = vmatmul.mubr.bf16.gmra.mrb[36].mxu0 %v1267_v58  ;;  %v1103_v58 = vmul.f32 %v2825_v36, %v867_v45  ;;  %v1117_v45 = vmul.f32 %v2828_v41, %v881_v31 }
 0x23d   :  { %1866 = vmatmul.mubr.bf16.gmra.mrb[36].mxu1 %v1269_v61  ;;  %1617 = vmatprep.mubr.bf16.mxu0 %v1272_v0  ;;  %v1112_v61 = vmul.f32 %v2831_v47, %v876_v53  ;;  %v1110_v0 = vmul.f32 %v2834_v50, %v874_v55  ;;  %v729_v53 = vld [vmem:[%s3616_s6 + $0x1c0] sm:$0xff]  ;;  %v887_v55 = vunpack.c.l.bf16 %v725_v21 }
 0x23e   :  { %2166 = vmatprep.mubr.msk.bf16.mxu1 %vm274_vm0, %v1274_v1  ;;  %v723_v1 = vld [vmem:[%s3616_s6 + $0x190] sm:$0xff]  ;;  %v1279_v5 = vpack.c.bf16 %v1103_v58, %v1099_v57  ;;  %v732_v57 = vld [vmem:[%s3616_s6 + $0x1d8] sm:$0xff] }
 0x23f   :  { %v1284_v10 = vpack.c.bf16 %v1112_v61, %v1108_v60  ;;  %v884_v11 = vunpack.c.h.bf16 %v723_v1  ;;  %v1286_v12 = vpack.c.bf16 %v1114_v62, %v1110_v0  ;;  %v883_v30 = vunpack.c.l.bf16 %v723_v1 }
 0x240   :  { %v893_v60 = vunpack.c.l.bf16 %v728_v28  ;;  %v1289_v61 = vpack.c.bf16 %v1121_v46, %v1117_v45  ;;  %v896_v62 = vunpack.c.h.bf16 %v729_v53  ;;  %v902_v3 = vunpack.c.h.bf16 %v732_v57 }
 0x241   :  { %v1123_v4 = vmul.f32 %v2825_v36, %v887_v55  ;;  %v905_v46 = vunpack.c.l.bf16 %v734_v23  ;;  %v914_v55 = vunpack.c.h.bf16 %v738_v40 }
 0x242   :  { %v1129_v7 = vmul.f32 %v2828_v41, %v893_v60  ;;  %v1132_v8 = vmul.f32 %v2831_v47, %v896_v62  ;;  %v1138_v43 = vmul.f32 %v2834_v50, %v902_v3  ;;  %v742_v3 = vld [vmem:[%s3616_s6 + $0x228] sm:$0xff] }
 0x244   :  { %1618 = vmatmul.mubr.bf16.gmra.mrb[40].mxu0 %v1271_v13  ;;  %v1111_v13 = vmul.f32 %v2825_v36, %v875_v6  ;;  %v1125_v6 = vmul.f32 %v2828_v41, %v889_v27 }
 0x245   :  { %1874 = vmatmul.mubr.bf16.gmra.mrb[40].mxu1 %v1273_v17  ;;  %1625 = vmatprep.mubr.bf16.mxu0 %v1276_v18  ;;  %v1120_v17 = vmul.f32 %v2831_v47, %v884_v11  ;;  %v1118_v18 = vmul.f32 %v2834_v50, %v882_v19  ;;  %v733_v11 = vld [vmem:[%s3616_s6 + $0x1e0] sm:$0xff]  ;;  %v895_v19 = vunpack.c.l.bf16 %v729_v53 }
 0x246   :  { %2167 = vmatprep.mubr.msk.bf16.mxu1 %vm274_vm0, %v1278_v22  ;;  %v727_v22 = vld [vmem:[%s3616_s6 + $0x1b0] sm:$0xff]  ;;  %v1283_v29 = vpack.c.bf16 %v1111_v13, %v1107_v24  ;;  %v736_v24 = vld [vmem:[%s3616_s6 + $0x1f8] sm:$0xff] }
 0x247   :  { %v1288_v34 = vpack.c.bf16 %v1120_v17, %v1116_v16  ;;  %v892_v37 = vunpack.c.h.bf16 %v727_v22  ;;  %v1290_v38 = vpack.c.bf16 %v1122_v20, %v1118_v18  ;;  %v891_v59 = vunpack.c.l.bf16 %v727_v22 }
 0x248   :  { %v901_v16 = vunpack.c.l.bf16 %v732_v57  ;;  %v1293_v17 = vpack.c.bf16 %v1129_v7, %v1125_v6  ;;  %v904_v20 = vunpack.c.h.bf16 %v733_v11  ;;  %v910_v26 = vunpack.c.h.bf16 %v736_v24 }
 0x249   :  { %v1131_v28 = vmul.f32 %v2825_v36, %v895_v19  ;;  %v913_v7 = vunpack.c.l.bf16 %v738_v40  ;;  %v922_v19 = vunpack.c.h.bf16 %v742_v3 }
 0x24a   :  { %v1137_v31 = vmul.f32 %v2828_v41, %v901_v16  ;;  %v1140_v32 = vmul.f32 %v2831_v47, %v904_v20  ;;  %v1146_v35 = vmul.f32 %v2834_v50, %v910_v26  ;;  %v746_v26 = vld [vmem:[%s3616_s6 + $0x248] sm:$0xff] }
 0x24c   :  { %1626 = vmatmul.mubr.bf16.gmra.mrb[44].mxu0 %v1275_v44  ;;  %v1119_v44 = vmul.f32 %v2825_v36, %v883_v30  ;;  %v1133_v30 = vmul.f32 %v2828_v41, %v897_v15 }
 0x24d   :  { %1882 = vmatmul.mubr.bf16.gmra.mrb[44].mxu1 %v1277_v49  ;;  %1633 = vmatprep.mubr.bf16.mxu0 %v1280_v51  ;;  %v1128_v49 = vmul.f32 %v2831_v47, %v892_v37  ;;  %v1126_v51 = vmul.f32 %v2834_v50, %v890_v39  ;;  %v737_v37 = vld [vmem:[%s3616_s6 + $0x200] sm:$0xff]  ;;  %v903_v39 = vunpack.c.l.bf16 %v733_v11 }
 0x24e   :  { %2168 = vmatprep.mubr.msk.bf16.mxu1 %vm274_vm0, %v1282_v54  ;;  %v731_v54 = vld [vmem:[%s3616_s6 + $0x1d0] sm:$0xff]  ;;  %v1287_v58 = vpack.c.bf16 %v1119_v44, %v1115_v42  ;;  %v740_v42 = vld [vmem:[%s3616_s6 + $0x218] sm:$0xff] }
 0x24f   :  { %v1292_v0 = vpack.c.bf16 %v1128_v49, %v1124_v48  ;;  %v900_v63 = vunpack.c.h.bf16 %v731_v54  ;;  %v1294_v1 = vpack.c.bf16 %v1130_v52, %v1126_v51  ;;  %v899_v14 = vunpack.c.l.bf16 %v731_v54 }
 0x250   :  { %v909_v48 = vunpack.c.l.bf16 %v736_v24  ;;  %v1297_v49 = vpack.c.bf16 %v1137_v31, %v1133_v30  ;;  %v912_v52 = vunpack.c.h.bf16 %v737_v37  ;;  %v918_v56 = vunpack.c.h.bf16 %v740_v42 }
 0x251   :  { %v1139_v57 = vmul.f32 %v2825_v36, %v903_v39  ;;  %v921_v31 = vunpack.c.l.bf16 %v742_v3  ;;  %v930_v39 = vunpack.c.h.bf16 %v746_v26 }
 0x252   :  { %v1145_v27 = vmul.f32 %v2828_v41, %v909_v48  ;;  %v1148_v60 = vmul.f32 %v2831_v47, %v912_v52  ;;  %v1154_v62 = vmul.f32 %v2834_v50, %v918_v56  ;;  %v750_v56 = vld [vmem:[%s3616_s6 + $0x268] sm:$0xff] }
 0x254   :  { %1634 = vmatmul.mubr.bf16.gmra.mrb[48].mxu0 %v1279_v5  ;;  %v1127_v5 = vmul.f32 %v2825_v36, %v891_v59  ;;  %v1141_v59 = vmul.f32 %v2828_v41, %v905_v46 }
 0x255   :  { %1890 = vmatmul.mubr.bf16.gmra.mrb[48].mxu1 %v1281_v9  ;;  %1641 = vmatprep.mubr.bf16.mxu0 %v1284_v10  ;;  %v1136_v9 = vmul.f32 %v2831_v47, %v900_v63  ;;  %v1134_v10 = vmul.f32 %v2834_v50, %v898_v2  ;;  %v741_v63 = vld [vmem:[%s3616_s6 + $0x220] sm:$0xff]  ;;  %v911_v2 = vunpack.c.l.bf16 %v737_v37 }
 0x256   :  { %2169 = vmatprep.mubr.msk.bf16.mxu1 %vm274_vm0, %v1286_v12  ;;  %v735_v12 = vld [vmem:[%s3616_s6 + $0x1f0] sm:$0xff]  ;;  %v1291_v13 = vpack.c.bf16 %v1127_v5, %v1123_v4  ;;  %v744_v4 = vld [vmem:[%s3616_s6 + $0x238] sm:$0xff] }
 0x257   :  { %v1296_v18 = vpack.c.bf16 %v1136_v9, %v1132_v8  ;;  %v908_v21 = vunpack.c.h.bf16 %v735_v12  ;;  %v1298_v22 = vpack.c.bf16 %v1138_v43, %v1134_v10  ;;  %v907_v45 = vunpack.c.l.bf16 %v735_v12 }
 0x258   :  { %v917_v8 = vunpack.c.l.bf16 %v740_v42  ;;  %v1301_v9 = vpack.c.bf16 %v1145_v27, %v1141_v59  ;;  %v920_v43 = vunpack.c.h.bf16 %v741_v63  ;;  %v926_v23 = vunpack.c.h.bf16 %v744_v4 }
 0x259   :  { %v1147_v24 = vmul.f32 %v2825_v36, %v911_v2  ;;  %v929_v27 = vunpack.c.l.bf16 %v746_v26  ;;  %v938_v2 = vunpack.c.h.bf16 %v750_v56 }
 0x25a   :  { %v1153_v15 = vmul.f32 %v2828_v41, %v917_v8  ;;  %v1156_v16 = vmul.f32 %v2831_v47, %v920_v43  ;;  %v1162_v20 = vmul.f32 %v2834_v50, %v926_v23  ;;  %v754_v23 = vld [vmem:[%s3616_s6 + $0x288] sm:$0xff] }
 0x25c   :  { %1642 = vmatmul.mubr.bf16.gmra.mrb[52].mxu0 %v1283_v29  ;;  %v1135_v29 = vmul.f32 %v2825_v36, %v899_v14  ;;  %v1149_v14 = vmul.f32 %v2828_v41, %v913_v7 }
 0x25d   :  { %1898 = vmatmul.mubr.bf16.gmra.mrb[52].mxu1 %v1285_v33  ;;  %1649 = vmatprep.mubr.bf16.mxu0 %v1288_v34  ;;  %v1144_v33 = vmul.f32 %v2831_v47, %v908_v21  ;;  %v1142_v34 = vmul.f32 %v2834_v50, %v906_v25  ;;  %v745_v21 = vld [vmem:[%s3616_s6 + $0x240] sm:$0xff]  ;;  %v919_v25 = vunpack.c.l.bf16 %v741_v63 }
 0x25e   :  { %2170 = vmatprep.mubr.msk.bf16.mxu1 %vm274_vm0, %v1290_v38  ;;  %v739_v38 = vld [vmem:[%s3616_s6 + $0x210] sm:$0xff]  ;;  %v1295_v44 = vpack.c.bf16 %v1135_v29, %v1131_v28  ;;  %v748_v28 = vld [vmem:[%s3616_s6 + $0x258] sm:$0xff] }
 0x25f   :  { %v1300_v51 = vpack.c.bf16 %v1144_v33, %v1140_v32  ;;  %v916_v53 = vunpack.c.h.bf16 %v739_v38  ;;  %v1302_v54 = vpack.c.bf16 %v1146_v35, %v1142_v34  ;;  %v915_v6 = vunpack.c.l.bf16 %v739_v38 }
 0x260   :  { %v925_v32 = vunpack.c.l.bf16 %v744_v4  ;;  %v1305_v33 = vpack.c.bf16 %v1153_v15, %v1149_v14  ;;  %v928_v35 = vunpack.c.h.bf16 %v745_v21  ;;  %v934_v40 = vunpack.c.h.bf16 %v748_v28 }
 0x261   :  { %v1155_v42 = vmul.f32 %v2825_v36, %v919_v25  ;;  %v937_v15 = vunpack.c.l.bf16 %v750_v56  ;;  %v946_v25 = vunpack.c.h.bf16 %v754_v23 }
 0x262   :  { %v1161_v46 = vmul.f32 %v2828_v41, %v925_v32  ;;  %v1164_v48 = vmul.f32 %v2831_v47, %v928_v35  ;;  %v1170_v52 = vmul.f32 %v2834_v50, %v934_v40  ;;  %v758_v40 = vld [vmem:[%s3616_s6 + $0x2a8] sm:$0xff] }
 0x264   :  { %1650 = vmatmul.mubr.bf16.gmra.mrb[56].mxu0 %v1287_v58  ;;  %v1143_v58 = vmul.f32 %v2825_v36, %v907_v45  ;;  %v1157_v45 = vmul.f32 %v2828_v41, %v921_v31 }
 0x265   :  { %1906 = vmatmul.mubr.bf16.gmra.mrb[56].mxu1 %v1289_v61  ;;  %1657 = vmatprep.mubr.bf16.mxu0 %v1292_v0  ;;  %v1152_v61 = vmul.f32 %v2831_v47, %v916_v53  ;;  %v1150_v0 = vmul.f32 %v2834_v50, %v914_v55  ;;  %v749_v53 = vld [vmem:[%s3616_s6 + $0x260] sm:$0xff]  ;;  %v927_v55 = vunpack.c.l.bf16 %v745_v21 }
 0x266   :  { %2171 = vmatprep.mubr.msk.bf16.mxu1 %vm274_vm0, %v1294_v1  ;;  %v743_v1 = vld [vmem:[%s3616_s6 + $0x230] sm:$0xff]  ;;  %v1299_v5 = vpack.c.bf16 %v1143_v58, %v1139_v57  ;;  %v752_v57 = vld [vmem:[%s3616_s6 + $0x278] sm:$0xff] }
 0x267   :  { %v1304_v10 = vpack.c.bf16 %v1152_v61, %v1148_v60  ;;  %v924_v11 = vunpack.c.h.bf16 %v743_v1  ;;  %v1306_v12 = vpack.c.bf16 %v1154_v62, %v1150_v0  ;;  %v923_v30 = vunpack.c.l.bf16 %v743_v1 }
 0x268   :  { %v933_v60 = vunpack.c.l.bf16 %v748_v28  ;;  %v1309_v61 = vpack.c.bf16 %v1161_v46, %v1157_v45  ;;  %v936_v62 = vunpack.c.h.bf16 %v749_v53  ;;  %v942_v3 = vunpack.c.h.bf16 %v752_v57 }
 0x269   :  { %v1163_v4 = vmul.f32 %v2825_v36, %v927_v55  ;;  %v945_v46 = vunpack.c.l.bf16 %v754_v23  ;;  %v954_v55 = vunpack.c.h.bf16 %v758_v40 }
 0x26a   :  { %v1169_v7 = vmul.f32 %v2828_v41, %v933_v60  ;;  %v1172_v8 = vmul.f32 %v2831_v47, %v936_v62  ;;  %v1178_v43 = vmul.f32 %v2834_v50, %v942_v3  ;;  %v762_v3 = vld [vmem:[%s3616_s6 + $0x2c8] sm:$0xff] }
 0x26c   :  { %1658 = vmatmul.mubr.bf16.gmra.mrb[60].mxu0 %v1291_v13  ;;  %v1151_v13 = vmul.f32 %v2825_v36, %v915_v6  ;;  %v1165_v6 = vmul.f32 %v2828_v41, %v929_v27 }
 0x26d   :  { %1914 = vmatmul.mubr.bf16.gmra.mrb[60].mxu1 %v1293_v17  ;;  %1665 = vmatprep.mubr.bf16.mxu0 %v1296_v18  ;;  %v1160_v17 = vmul.f32 %v2831_v47, %v924_v11  ;;  %v1158_v18 = vmul.f32 %v2834_v50, %v922_v19  ;;  %v753_v11 = vld [vmem:[%s3616_s6 + $0x280] sm:$0xff]  ;;  %v935_v19 = vunpack.c.l.bf16 %v749_v53 }
 0x26e   :  { %2172 = vmatprep.mubr.msk.bf16.mxu1 %vm274_vm0, %v1298_v22  ;;  %v747_v22 = vld [vmem:[%s3616_s6 + $0x250] sm:$0xff]  ;;  %v1303_v29 = vpack.c.bf16 %v1151_v13, %v1147_v24  ;;  %v756_v24 = vld [vmem:[%s3616_s6 + $0x298] sm:$0xff] }
 0x26f   :  { %v1308_v34 = vpack.c.bf16 %v1160_v17, %v1156_v16  ;;  %v932_v37 = vunpack.c.h.bf16 %v747_v22  ;;  %v1310_v38 = vpack.c.bf16 %v1162_v20, %v1158_v18  ;;  %v931_v59 = vunpack.c.l.bf16 %v747_v22 }
 0x270   :  { %v941_v16 = vunpack.c.l.bf16 %v752_v57  ;;  %v1313_v17 = vpack.c.bf16 %v1169_v7, %v1165_v6  ;;  %v944_v20 = vunpack.c.h.bf16 %v753_v11  ;;  %v950_v26 = vunpack.c.h.bf16 %v756_v24 }
 0x271   :  { %v1171_v28 = vmul.f32 %v2825_v36, %v935_v19  ;;  %v953_v7 = vunpack.c.l.bf16 %v758_v40  ;;  %v962_v19 = vunpack.c.h.bf16 %v762_v3 }
 0x272   :  { %v1177_v31 = vmul.f32 %v2828_v41, %v941_v16  ;;  %v1180_v32 = vmul.f32 %v2831_v47, %v944_v20  ;;  %v1186_v35 = vmul.f32 %v2834_v50, %v950_v26  ;;  %v766_v26 = vld [vmem:[%s3616_s6 + $0x2e8] sm:$0xff] }
 0x274   :  { %1666 = vmatmul.mubr.bf16.gmra.mrb[64].mxu0 %v1295_v44  ;;  %v1159_v44 = vmul.f32 %v2825_v36, %v923_v30  ;;  %v1173_v30 = vmul.f32 %v2828_v41, %v937_v15 }
 0x275   :  { %1922 = vmatmul.mubr.bf16.gmra.mrb[64].mxu1 %v1297_v49  ;;  %1673 = vmatprep.mubr.bf16.mxu0 %v1300_v51  ;;  %v1168_v49 = vmul.f32 %v2831_v47, %v932_v37  ;;  %v1166_v51 = vmul.f32 %v2834_v50, %v930_v39  ;;  %v757_v37 = vld [vmem:[%s3616_s6 + $0x2a0] sm:$0xff]  ;;  %v943_v39 = vunpack.c.l.bf16 %v753_v11 }
 0x276   :  { %2173 = vmatprep.mubr.msk.bf16.mxu1 %vm274_vm0, %v1302_v54  ;;  %v751_v54 = vld [vmem:[%s3616_s6 + $0x270] sm:$0xff]  ;;  %v1307_v58 = vpack.c.bf16 %v1159_v44, %v1155_v42  ;;  %v760_v42 = vld [vmem:[%s3616_s6 + $0x2b8] sm:$0xff] }
 0x277   :  { %v1312_v0 = vpack.c.bf16 %v1168_v49, %v1164_v48  ;;  %v940_v63 = vunpack.c.h.bf16 %v751_v54  ;;  %v1314_v1 = vpack.c.bf16 %v1170_v52, %v1166_v51  ;;  %v939_v14 = vunpack.c.l.bf16 %v751_v54 }
 0x278   :  { %v949_v48 = vunpack.c.l.bf16 %v756_v24  ;;  %v1317_v49 = vpack.c.bf16 %v1177_v31, %v1173_v30  ;;  %v952_v52 = vunpack.c.h.bf16 %v757_v37  ;;  %v958_v56 = vunpack.c.h.bf16 %v760_v42 }
 0x279   :  { %v1179_v57 = vmul.f32 %v2825_v36, %v943_v39  ;;  %v961_v31 = vunpack.c.l.bf16 %v762_v3  ;;  %v970_v39 = vunpack.c.h.bf16 %v766_v26 }
 0x27a   :  { %v1185_v27 = vmul.f32 %v2828_v41, %v949_v48  ;;  %v1188_v60 = vmul.f32 %v2831_v47, %v952_v52  ;;  %v1194_v62 = vmul.f32 %v2834_v50, %v958_v56  ;;  %v770_v56 = vld [vmem:[%s3616_s6 + $0x308] sm:$0xff] }
 0x27c   :  { %1674 = vmatmul.mubr.bf16.gmra.mrb[68].mxu0 %v1299_v5  ;;  %v1167_v5 = vmul.f32 %v2825_v36, %v931_v59  ;;  %v1181_v59 = vmul.f32 %v2828_v41, %v945_v46 }
 0x27d   :  { %1930 = vmatmul.mubr.bf16.gmra.mrb[68].mxu1 %v1301_v9  ;;  %1681 = vmatprep.mubr.bf16.mxu0 %v1304_v10  ;;  %v1176_v9 = vmul.f32 %v2831_v47, %v940_v63  ;;  %v1174_v10 = vmul.f32 %v2834_v50, %v938_v2  ;;  %v761_v63 = vld [vmem:[%s3616_s6 + $0x2c0] sm:$0xff]  ;;  %v951_v2 = vunpack.c.l.bf16 %v757_v37 }
 0x27e   :  { %2174 = vmatprep.mubr.msk.bf16.mxu1 %vm274_vm0, %v1306_v12  ;;  %v755_v12 = vld [vmem:[%s3616_s6 + $0x290] sm:$0xff]  ;;  %v1311_v13 = vpack.c.bf16 %v1167_v5, %v1163_v4  ;;  %v764_v4 = vld [vmem:[%s3616_s6 + $0x2d8] sm:$0xff] }
 0x27f   :  { %v1316_v18 = vpack.c.bf16 %v1176_v9, %v1172_v8  ;;  %v948_v21 = vunpack.c.h.bf16 %v755_v12  ;;  %v1318_v22 = vpack.c.bf16 %v1178_v43, %v1174_v10  ;;  %v947_v45 = vunpack.c.l.bf16 %v755_v12 }
 0x280   :  { %v957_v8 = vunpack.c.l.bf16 %v760_v42  ;;  %v1321_v9 = vpack.c.bf16 %v1185_v27, %v1181_v59  ;;  %v960_v43 = vunpack.c.h.bf16 %v761_v63  ;;  %v966_v23 = vunpack.c.h.bf16 %v764_v4 }
 0x281   :  { %v1187_v24 = vmul.f32 %v2825_v36, %v951_v2  ;;  %v969_v27 = vunpack.c.l.bf16 %v766_v26  ;;  %v978_v2 = vunpack.c.h.bf16 %v770_v56 }
 0x282   :  { %v1193_v15 = vmul.f32 %v2828_v41, %v957_v8  ;;  %v1196_v16 = vmul.f32 %v2831_v47, %v960_v43  ;;  %v1202_v20 = vmul.f32 %v2834_v50, %v966_v23  ;;  %v774_v23 = vld [vmem:[%s3616_s6 + $0x328] sm:$0xff] }
 0x284   :  { %1682 = vmatmul.mubr.bf16.gmra.mrb[72].mxu0 %v1303_v29  ;;  %v1175_v29 = vmul.f32 %v2825_v36, %v939_v14  ;;  %v1189_v14 = vmul.f32 %v2828_v41, %v953_v7 }
 0x285   :  { %1938 = vmatmul.mubr.bf16.gmra.mrb[72].mxu1 %v1305_v33  ;;  %1689 = vmatprep.mubr.bf16.mxu0 %v1308_v34  ;;  %v1184_v33 = vmul.f32 %v2831_v47, %v948_v21  ;;  %v1182_v34 = vmul.f32 %v2834_v50, %v946_v25  ;;  %v765_v21 = vld [vmem:[%s3616_s6 + $0x2e0] sm:$0xff]  ;;  %v959_v25 = vunpack.c.l.bf16 %v761_v63 }
 0x286   :  { %2175 = vmatprep.mubr.msk.bf16.mxu1 %vm274_vm0, %v1310_v38  ;;  %v759_v38 = vld [vmem:[%s3616_s6 + $0x2b0] sm:$0xff]  ;;  %v1315_v44 = vpack.c.bf16 %v1175_v29, %v1171_v28  ;;  %v768_v28 = vld [vmem:[%s3616_s6 + $0x2f8] sm:$0xff] }
 0x287   :  { %v1320_v51 = vpack.c.bf16 %v1184_v33, %v1180_v32  ;;  %v956_v53 = vunpack.c.h.bf16 %v759_v38  ;;  %v1322_v54 = vpack.c.bf16 %v1186_v35, %v1182_v34  ;;  %v955_v6 = vunpack.c.l.bf16 %v759_v38 }
 0x288   :  { %v965_v32 = vunpack.c.l.bf16 %v764_v4  ;;  %v1325_v33 = vpack.c.bf16 %v1193_v15, %v1189_v14  ;;  %v968_v35 = vunpack.c.h.bf16 %v765_v21  ;;  %v974_v40 = vunpack.c.h.bf16 %v768_v28 }
 0x289   :  { %v1195_v42 = vmul.f32 %v2825_v36, %v959_v25  ;;  %v977_v15 = vunpack.c.l.bf16 %v770_v56  ;;  %v986_v25 = vunpack.c.h.bf16 %v774_v23 }
 0x28a   :  { %v1201_v46 = vmul.f32 %v2828_v41, %v965_v32  ;;  %v1204_v48 = vmul.f32 %v2831_v47, %v968_v35  ;;  %v1210_v52 = vmul.f32 %v2834_v50, %v974_v40  ;;  %v778_v40 = vld [vmem:[%s3616_s6 + $0x348] sm:$0xff] }
 0x28c   :  { %1690 = vmatmul.mubr.bf16.gmra.mrb[76].mxu0 %v1307_v58  ;;  %v1183_v58 = vmul.f32 %v2825_v36, %v947_v45  ;;  %v1197_v45 = vmul.f32 %v2828_v41, %v961_v31 }
 0x28d   :  { %1946 = vmatmul.mubr.bf16.gmra.mrb[76].mxu1 %v1309_v61  ;;  %1697 = vmatprep.mubr.bf16.mxu0 %v1312_v0  ;;  %v1192_v61 = vmul.f32 %v2831_v47, %v956_v53  ;;  %v1190_v0 = vmul.f32 %v2834_v50, %v954_v55  ;;  %v769_v53 = vld [vmem:[%s3616_s6 + $0x300] sm:$0xff]  ;;  %v967_v55 = vunpack.c.l.bf16 %v765_v21 }
 0x28e   :  { %2176 = vmatprep.mubr.msk.bf16.mxu1 %vm274_vm0, %v1314_v1  ;;  %v763_v1 = vld [vmem:[%s3616_s6 + $0x2d0] sm:$0xff]  ;;  %v1319_v5 = vpack.c.bf16 %v1183_v58, %v1179_v57  ;;  %v772_v57 = vld [vmem:[%s3616_s6 + $0x318] sm:$0xff] }
 0x28f   :  { %v1324_v10 = vpack.c.bf16 %v1192_v61, %v1188_v60  ;;  %v964_v11 = vunpack.c.h.bf16 %v763_v1  ;;  %v1326_v12 = vpack.c.bf16 %v1194_v62, %v1190_v0  ;;  %v963_v30 = vunpack.c.l.bf16 %v763_v1 }
 0x290   :  { %v973_v60 = vunpack.c.l.bf16 %v768_v28  ;;  %v1329_v61 = vpack.c.bf16 %v1201_v46, %v1197_v45  ;;  %v976_v62 = vunpack.c.h.bf16 %v769_v53  ;;  %v982_v3 = vunpack.c.h.bf16 %v772_v57 }
 0x291   :  { %v1203_v4 = vmul.f32 %v2825_v36, %v967_v55  ;;  %v985_v46 = vunpack.c.l.bf16 %v774_v23  ;;  %v994_v55 = vunpack.c.h.bf16 %v778_v40 }
 0x292   :  { %v1209_v7 = vmul.f32 %v2828_v41, %v973_v60  ;;  %v1212_v8 = vmul.f32 %v2831_v47, %v976_v62  ;;  %v1218_v43 = vmul.f32 %v2834_v50, %v982_v3 }
 0x294   :  { %1698 = vmatmul.mubr.bf16.gmra.mrb[80].mxu0 %v1311_v13  ;;  %v1191_v13 = vmul.f32 %v2825_v36, %v955_v6  ;;  %v1205_v6 = vmul.f32 %v2828_v41, %v969_v27 }
 0x295   :  { %1954 = vmatmul.mubr.bf16.gmra.mrb[80].mxu1 %v1313_v17  ;;  %1705 = vmatprep.mubr.bf16.mxu0 %v1316_v18  ;;  %v1200_v17 = vmul.f32 %v2831_v47, %v964_v11  ;;  %v1198_v18 = vmul.f32 %v2834_v50, %v962_v19  ;;  %v773_v11 = vld [vmem:[%s3616_s6 + $0x320] sm:$0xff]  ;;  %v975_v19 = vunpack.c.l.bf16 %v769_v53 }
 0x296   :  { %2177 = vmatprep.mubr.msk.bf16.mxu1 %vm274_vm0, %v1318_v22  ;;  %v767_v22 = vld [vmem:[%s3616_s6 + $0x2f0] sm:$0xff]  ;;  %v1323_v29 = vpack.c.bf16 %v1191_v13, %v1187_v24  ;;  %v776_v24 = vld [vmem:[%s3616_s6 + $0x338] sm:$0xff] }
 0x297   :  { %v1328_v34 = vpack.c.bf16 %v1200_v17, %v1196_v16  ;;  %v972_v37 = vunpack.c.h.bf16 %v767_v22  ;;  %v1330_v38 = vpack.c.bf16 %v1202_v20, %v1198_v18  ;;  %v971_v59 = vunpack.c.l.bf16 %v767_v22 }
 0x298   :  { %v981_v16 = vunpack.c.l.bf16 %v772_v57  ;;  %v1333_v17 = vpack.c.bf16 %v1209_v7, %v1205_v6  ;;  %v984_v20 = vunpack.c.h.bf16 %v773_v11  ;;  %v990_v26 = vunpack.c.h.bf16 %v776_v24 }
 0x299   :  { %v1211_v28 = vmul.f32 %v2825_v36, %v975_v19 }
 0x29a   :  { %v1217_v31 = vmul.f32 %v2828_v41, %v981_v16  ;;  %v1220_v32 = vmul.f32 %v2831_v47, %v984_v20  ;;  %v1226_v35 = vmul.f32 %v2834_v50, %v990_v26 }
 0x29c   :  { %1706 = vmatmul.mubr.bf16.gmra.mrb[84].mxu0 %v1315_v44  ;;  %v1199_v44 = vmul.f32 %v2825_v36, %v963_v30  ;;  %v1213_v30 = vmul.f32 %v2828_v41, %v977_v15 }
 0x29d   :  { %1962 = vmatmul.mubr.bf16.gmra.mrb[84].mxu1 %v1317_v49  ;;  %1713 = vmatprep.mubr.bf16.mxu0 %v1320_v51  ;;  %v1208_v49 = vmul.f32 %v2831_v47, %v972_v37  ;;  %v1206_v51 = vmul.f32 %v2834_v50, %v970_v39  ;;  %v777_v37 = vld [vmem:[%s3616_s6 + $0x340] sm:$0xff]  ;;  %v983_v39 = vunpack.c.l.bf16 %v773_v11 }
 0x29e   :  { %2178 = vmatprep.mubr.msk.bf16.mxu1 %vm274_vm0, %v1322_v54  ;;  %v771_v54 = vld [vmem:[%s3616_s6 + $0x310] sm:$0xff]  ;;  %v1327_v58 = vpack.c.bf16 %v1199_v44, %v1195_v42  ;;  %v780_v42 = vld [vmem:[%s3616_s6 + $0x358] sm:$0xff]  ;;  %v991_v3 = vunpack.c.l.bf16 %v777_v37 }
 0x29f   :  { %v1332_v0 = vpack.c.bf16 %v1208_v49, %v1204_v48  ;;  %v980_v63 = vunpack.c.h.bf16 %v771_v54  ;;  %v1334_v1 = vpack.c.bf16 %v1210_v52, %v1206_v51  ;;  %v979_v14 = vunpack.c.l.bf16 %v771_v54 }
 0x2a0   :  { %v989_v48 = vunpack.c.l.bf16 %v776_v24  ;;  %v1337_v49 = vpack.c.bf16 %v1217_v31, %v1213_v30  ;;  %v992_v52 = vunpack.c.h.bf16 %v777_v37  ;;  %v998_v56 = vunpack.c.h.bf16 %v780_v42 }
 0x2a1   :  { %v1219_v57 = vmul.f32 %v2825_v36, %v983_v39  ;;  %v1227_v11 = vmul.f32 %v2825_v36, %v991_v3 }
 0x2a2   :  { %v1225_v27 = vmul.f32 %v2828_v41, %v989_v48  ;;  %v1228_v60 = vmul.f32 %v2831_v47, %v992_v52  ;;  %v1234_v62 = vmul.f32 %v2834_v50, %v998_v56 }
 0x2a4   :  { %1714 = vmatmul.mubr.bf16.gmra.mrb[88].mxu0 %v1319_v5  ;;  %v1207_v5 = vmul.f32 %v2825_v36, %v971_v59  ;;  %v1221_v59 = vmul.f32 %v2828_v41, %v985_v46 }
 0x2a5   :  { %1970 = vmatmul.mubr.bf16.gmra.mrb[88].mxu1 %v1321_v9  ;;  %1721 = vmatprep.mubr.bf16.mxu0 %v1324_v10  ;;  %v1216_v9 = vmul.f32 %v2831_v47, %v980_v63  ;;  %v1214_v10 = vmul.f32 %v2834_v50, %v978_v2  ;;  %v781_v63 = vld [vmem:[%s3616_s6 + $0x360] sm:$0xff] }
 0x2a6   :  { %2179 = vmatprep.mubr.msk.bf16.mxu1 %vm274_vm0, %v1326_v12  ;;  %v775_v12 = vld [vmem:[%s3616_s6 + $0x330] sm:$0xff]  ;;  %v1331_v13 = vpack.c.bf16 %v1207_v5, %v1203_v4  ;;  %v993_v5 = vunpack.c.l.bf16 %v778_v40  ;;  %v1341_v6 = vpack.c.bf16 %v1225_v27, %v1221_v59  ;;  %v999_v15 = vunpack.c.l.bf16 %v781_v63 }
 0x2a7   :  { %v1336_v18 = vpack.c.bf16 %v1216_v9, %v1212_v8  ;;  %v988_v21 = vunpack.c.h.bf16 %v775_v12  ;;  %v1338_v22 = vpack.c.bf16 %v1218_v43, %v1214_v10  ;;  %v987_v45 = vunpack.c.l.bf16 %v775_v12 }
 0x2a8   :  { %v997_v8 = vunpack.c.l.bf16 %v780_v42  ;;  %v1000_v9 = vunpack.c.h.bf16 %v781_v63  ;;  %v1229_v19 = vmul.f32 %v2828_v41, %v993_v5 }
 0x2aa   :  { %v1233_v23 = vmul.f32 %v2828_v41, %v997_v8  ;;  %v1236_v24 = vmul.f32 %v2831_v47, %v1000_v9 }
 0x2ac   :  { %1722 = vmatmul.mubr.bf16.gmra.mrb[92].mxu0 %v1323_v29  ;;  %v1215_v29 = vmul.f32 %v2825_v36, %v979_v14  ;;  %v1345_v16 = vpack.c.bf16 %v1233_v23, %v1229_v19 }
 0x2ad   :  { %1978 = vmatmul.mubr.bf16.gmra.mrb[92].mxu1 %v1325_v33  ;;  %1729 = vmatprep.mubr.bf16.mxu0 %v1328_v34  ;;  %v1224_v33 = vmul.f32 %v2831_v47, %v988_v21  ;;  %v1222_v34 = vmul.f32 %v2834_v50, %v986_v25  ;;  %v1235_v21 = vmul.f32 %v2825_v36, %v999_v15 }
 0x2ae   :  { %2180 = vmatprep.mubr.msk.bf16.mxu1 %vm274_vm0, %v1330_v38  ;;  %v779_v38 = vld [vmem:[%s3616_s6 + $0x350] sm:$0xff]  ;;  %v1335_v44 = vpack.c.bf16 %v1215_v29, %v1211_v28 }
 0x2af   :  { %v1340_v51 = vpack.c.bf16 %v1224_v33, %v1220_v32  ;;  %v996_v53 = vunpack.c.h.bf16 %v779_v38  ;;  %v1342_v54 = vpack.c.bf16 %v1226_v35, %v1222_v34  ;;  %v995_v4 = vunpack.c.l.bf16 %v779_v38 }
 0x2b0   :  { %v1347_v32 = vpack.c.bf16 %v1235_v21, %v1235_v21 }
 0x2b1   :  { %v1231_v12 = vmul.f32 %v2825_v36, %v995_v4 }
 0x2b3   :  { %v1343_v14 = vpack.c.bf16 %v1231_v12, %v1227_v11 }
 0x2b4   :  { %1730 = vmatmul.mubr.bf16.gmra.mrb[96].mxu0 %v1327_v58  ;;  %v1223_v58 = vmul.f32 %v2825_v36, %v987_v45 }
 0x2b5   :  { %1986 = vmatmul.mubr.bf16.gmra.mrb[96].mxu1 %v1329_v61  ;;  %1737 = vmatprep.mubr.bf16.mxu0 %v1332_v0  ;;  %v1232_v61 = vmul.f32 %v2831_v47, %v996_v53  ;;  %v1230_v0 = vmul.f32 %v2834_v50, %v994_v55 }
 0x2b6   :  { %2181 = vmatprep.mubr.msk.bf16.mxu1 %vm274_vm0, %v1334_v1  ;;  %v782_v1 = vld [vmem:[%s3616_s6 + $0x368] sm:$0xff]  ;;  %v1339_v2 = vpack.c.bf16 %v1223_v58, %v1219_v57 }
 0x2b7   :  { %v1344_v7 = vpack.c.bf16 %v1232_v61, %v1228_v60  ;;  %v1346_v10 = vpack.c.bf16 %v1234_v62, %v1230_v0  ;;  %v1002_v43 = vunpack.c.h.bf16 %v782_v1 }
 0x2bc   :  { %1738 = vmatmul.mubr.bf16.gmra.mrb[100].mxu0 %v1331_v13  ;;  %v1238_v13 = vmul.f32 %v2834_v50, %v1002_v43 }
 0x2bd   :  { %1994 = vmatmul.mubr.bf16.gmra.mrb[100].mxu1 %v1333_v17  ;;  %1745 = vmatprep.mubr.bf16.mxu0 %v1336_v18  ;;  %v1348_v17 = vpack.c.bf16 %v1236_v24, %v1236_v24  ;;  %v1001_v18 = vunpack.c.l.bf16 %v782_v1 }
 0x2be   :  { %2182 = vmatprep.mubr.msk.bf16.mxu1 %vm274_vm0, %v1338_v22  ;;  %v1350_v20 = vpack.c.bf16 %v1238_v13, %v1238_v13 }
 0x2bf   :  { %v1237_v25 = vmul.f32 %v2828_v41, %v1001_v18 }
 0x2c1   :  { %v1349_v36 = vpack.c.bf16 %v1237_v25, %v1237_v25 }
 0x2c4   :  { %1746 = vmatmul.mubr.bf16.gmra.mrb[104].mxu0 %v1335_v44 }
 0x2c5   :  { %2002 = vmatmul.mubr.bf16.gmra.mrb[104].mxu1 %v1337_v49  ;;  %1753 = vmatprep.mubr.bf16.mxu0 %v1340_v51 }
 0x2c6   :  { %2183 = vmatprep.mubr.msk.bf16.mxu1 %vm274_vm0, %v1342_v54 }
 0x2cc   :  { %1754 = vmatmul.mubr.bf16.gmra.mrb[108].mxu0 %v1339_v2 }
 0x2cd   :  { %2010 = vmatmul.mubr.bf16.gmra.mrb[108].mxu1 %v1341_v6  ;;  %1761 = vmatprep.mubr.bf16.mxu0 %v1344_v7 }
 0x2ce   :  { %2184 = vmatprep.mubr.msk.bf16.mxu1 %vm274_vm0, %v1346_v10 }
 0x2d4   :  { %1762 = vmatmul.mubr.bf16.gmra.mrb[112].mxu0 %v1343_v14 }
 0x2d5   :  { %2018 = vmatmul.mubr.bf16.gmra.mrb[112].mxu1 %v1345_v16  ;;  %1769 = vmatprep.mubr.bf16.mxu0 %v1348_v17 }
 0x2d6   :  { %2185 = vmatprep.mubr.msk.bf16.mxu1 %vm274_vm0, %v1350_v20 }
 0x2d7   :  { %v1555_v22 = vpop.f32.mrb[8].mxu0 }
 0x2d8   :  { %v1811_v26 = vpop.f32.mrb[8].mxu1  ;;  %v1557_v47 = vpop.f32.mrb[9].mxu0 }
 0x2d9   :  { %v1812_v50 = vadd.f32 %v1811_v26, %v1555_v22  ;;  %v1813_v28 = vpop.f32.mrb[9].mxu1  ;;  %v1558_v29 = vpop.f32.mrb[10].mxu0 }
 0x2da   :  { %v1814_v30 = vpop.f32.mrb[10].mxu1  ;;  %v1560_v31 = vpop.f32.mrb[11].mxu0 }
 0x2db   :  { %2034 = vst.msk [vmem:[%s3617_s7] sm:$0xff] %vm2033_vm4, %v1812_v50  ;;  %v1815_v33 = vadd.f32 %v1814_v30, %v1558_v29  ;;  %v1816_v34 = vpop.f32.mrb[11].mxu1 }
 0x2dc   :  { %1770 = vmatmul.mubr.bf16.gmra.mrb[116].mxu0 %v1347_v32 }
 0x2dd   :  { %2035 = vst.msk [vmem:[%s3617_s7 + $0x8] sm:$0xff] %vm2033_vm4, %v1815_v33  ;;  %2026 = vmatmul.mubr.bf16.gmra.mrb[116].mxu1 %v1349_v36 }
 0x2df   :  { %v1563_v41 = vpop.f32.mrb[12].mxu0 }
 0x2e0   :  { %v1819_v35 = vpop.f32.mrb[12].mxu1  ;;  %v1565_v37 = vpop.f32.mrb[13].mxu0 }
 0x2e1   :  { %v1820_v38 = vadd.f32 %v1819_v35, %v1563_v41  ;;  %v1821_v39 = vpop.f32.mrb[13].mxu1  ;;  %v1566_v40 = vpop.f32.mrb[14].mxu0 }
 0x2e2   :  { %v1822_v42 = vpop.f32.mrb[14].mxu1  ;;  %v1568_v44 = vpop.f32.mrb[15].mxu0 }
 0x2e3   :  { %2036 = vst.msk [vmem:[%s3617_s7 + $0x10] sm:$0xff] %vm2033_vm4, %v1820_v38  ;;  %v1823_v45 = vadd.f32 %v1822_v42, %v1566_v40  ;;  %v1824_v46 = vpop.f32.mrb[15].mxu1 }
 0x2e5   :  { %2037 = vst.msk [vmem:[%s3617_s7 + $0x18] sm:$0xff] %vm2033_vm4, %v1823_v45 }
 0x2e7   :  { %v1571_v48 = vpop.f32.mrb[16].mxu0 }
 0x2e8   :  { %v1827_v49 = vpop.f32.mrb[16].mxu1  ;;  %v1573_v51 = vpop.f32.mrb[17].mxu0 }
 0x2e9   :  { %v1828_v52 = vadd.f32 %v1827_v49, %v1571_v48  ;;  %v1829_v53 = vpop.f32.mrb[17].mxu1  ;;  %v1574_v54 = vpop.f32.mrb[18].mxu0 }
 0x2ea   :  { %v1830_v55 = vpop.f32.mrb[18].mxu1  ;;  %v1576_v56 = vpop.f32.mrb[19].mxu0 }
 0x2eb   :  { %2038 = vst.msk [vmem:[%s3617_s7 + $0x20] sm:$0xff] %vm2033_vm4, %v1828_v52  ;;  %v1831_v57 = vadd.f32 %v1830_v55, %v1574_v54  ;;  %v1832_v58 = vpop.f32.mrb[19].mxu1 }
 0x2ed   :  { %2039 = vst.msk [vmem:[%s3617_s7 + $0x28] sm:$0xff] %vm2033_vm4, %v1831_v57 }
 0x2ef   :  { %v1579_v59 = vpop.f32.mrb[20].mxu0 }
 0x2f0   :  { %v1835_v27 = vpop.f32.mrb[20].mxu1  ;;  %v1581_v60 = vpop.f32.mrb[21].mxu0 }
 0x2f1   :  { %v1836_v61 = vadd.f32 %v1835_v27, %v1579_v59  ;;  %v1837_v0 = vpop.f32.mrb[21].mxu1  ;;  %v1582_v62 = vpop.f32.mrb[22].mxu0 }
 0x2f2   :  { %v1838_v63 = vpop.f32.mrb[22].mxu1  ;;  %v1584_v1 = vpop.f32.mrb[23].mxu0 }
 0x2f3   :  { %2040 = vst.msk [vmem:[%s3617_s7 + $0x30] sm:$0xff] %vm2033_vm4, %v1836_v61  ;;  %v1839_v2 = vadd.f32 %v1838_v63, %v1582_v62  ;;  %v1840_v3 = vpop.f32.mrb[23].mxu1 }
 0x2f5   :  { %2041 = vst.msk [vmem:[%s3617_s7 + $0x38] sm:$0xff] %vm2033_vm4, %v1839_v2 }
 0x2f7   :  { %v1587_v4 = vpop.f32.mrb[24].mxu0 }
 0x2f8   :  { %v1843_v5 = vpop.f32.mrb[24].mxu1  ;;  %v1589_v6 = vpop.f32.mrb[25].mxu0 }
 0x2f9   :  { %v1844_v7 = vadd.f32 %v1843_v5, %v1587_v4  ;;  %v1845_v8 = vpop.f32.mrb[25].mxu1  ;;  %v1590_v9 = vpop.f32.mrb[26].mxu0 }
 0x2fa   :  { %v1846_v10 = vpop.f32.mrb[26].mxu1  ;;  %v1592_v43 = vpop.f32.mrb[27].mxu0 }
 0x2fb   :  { %2042 = vst.msk [vmem:[%s3617_s7 + $0x40] sm:$0xff] %vm2033_vm4, %v1844_v7  ;;  %v1847_v11 = vadd.f32 %v1846_v10, %v1590_v9  ;;  %v1848_v12 = vpop.f32.mrb[27].mxu1 }
 0x2fd   :  { %2043 = vst.msk [vmem:[%s3617_s7 + $0x48] sm:$0xff] %vm2033_vm4, %v1847_v11 }
 0x2ff   :  { %v1595_v19 = vpop.f32.mrb[28].mxu0 }
 0x300   :  { %v1851_v23 = vpop.f32.mrb[28].mxu1  ;;  %v1597_v24 = vpop.f32.mrb[29].mxu0 }
 0x301   :  { %v1852_v13 = vadd.f32 %v1851_v23, %v1595_v19  ;;  %v1853_v14 = vpop.f32.mrb[29].mxu1  ;;  %v1598_v15 = vpop.f32.mrb[30].mxu0 }
 0x302   :  { %v1854_v16 = vpop.f32.mrb[30].mxu1  ;;  %v1600_v17 = vpop.f32.mrb[31].mxu0 }
 0x303   :  { %2044 = vst.msk [vmem:[%s3617_s7 + $0x50] sm:$0xff] %vm2033_vm4, %v1852_v13  ;;  %v1855_v18 = vadd.f32 %v1854_v16, %v1598_v15  ;;  %v1856_v20 = vpop.f32.mrb[31].mxu1 }
 0x305   :  { %2045 = vst.msk [vmem:[%s3617_s7 + $0x58] sm:$0xff] %vm2033_vm4, %v1855_v18 }
 0x307   :  { %v1603_v21 = vpop.f32.mrb[32].mxu0 }
 0x308   :  { %v1859_v22 = vpop.f32.mrb[32].mxu1  ;;  %v1605_v25 = vpop.f32.mrb[33].mxu0 }
 0x309   :  { %v1860_v26 = vadd.f32 %v1859_v22, %v1603_v21  ;;  %v1861_v47 = vpop.f32.mrb[33].mxu1  ;;  %v1606_v50 = vpop.f32.mrb[34].mxu0 }
 0x30a   :  { %v1862_v28 = vpop.f32.mrb[34].mxu1  ;;  %v1608_v29 = vpop.f32.mrb[35].mxu0 }
 0x30b   :  { %2046 = vst.msk [vmem:[%s3617_s7 + $0x60] sm:$0xff] %vm2033_vm4, %v1860_v26  ;;  %v1863_v30 = vadd.f32 %v1862_v28, %v1606_v50  ;;  %v1864_v31 = vpop.f32.mrb[35].mxu1 }
 0x30d   :  { %2047 = vst.msk [vmem:[%s3617_s7 + $0x68] sm:$0xff] %vm2033_vm4, %v1863_v30 }
 0x30f   :  { %v1611_v32 = vpop.f32.mrb[36].mxu0 }
 0x310   :  { %v1867_v33 = vpop.f32.mrb[36].mxu1  ;;  %v1613_v34 = vpop.f32.mrb[37].mxu0 }
 0x311   :  { %v1868_v36 = vadd.f32 %v1867_v33, %v1611_v32  ;;  %v1869_v41 = vpop.f32.mrb[37].mxu1  ;;  %v1614_v35 = vpop.f32.mrb[38].mxu0 }
 0x312   :  { %v1870_v37 = vpop.f32.mrb[38].mxu1  ;;  %v1616_v38 = vpop.f32.mrb[39].mxu0 }
 0x313   :  { %2048 = vst.msk [vmem:[%s3617_s7 + $0x70] sm:$0xff] %vm2033_vm4, %v1868_v36  ;;  %v1871_v39 = vadd.f32 %v1870_v37, %v1614_v35  ;;  %v1872_v40 = vpop.f32.mrb[39].mxu1 }
 0x315   :  { %2049 = vst.msk [vmem:[%s3617_s7 + $0x78] sm:$0xff] %vm2033_vm4, %v1871_v39 }
 0x317   :  { %v1619_v42 = vpop.f32.mrb[40].mxu0 }
 0x318   :  { %v1875_v44 = vpop.f32.mrb[40].mxu1  ;;  %v1621_v45 = vpop.f32.mrb[41].mxu0 }
 0x319   :  { %v1876_v46 = vadd.f32 %v1875_v44, %v1619_v42  ;;  %v1877_v48 = vpop.f32.mrb[41].mxu1  ;;  %v1622_v49 = vpop.f32.mrb[42].mxu0 }
 0x31a   :  { %v1878_v51 = vpop.f32.mrb[42].mxu1  ;;  %v1624_v52 = vpop.f32.mrb[43].mxu0 }
 0x31b   :  { %2050 = vst.msk [vmem:[%s3617_s7 + $0x80] sm:$0xff] %vm2033_vm4, %v1876_v46  ;;  %v1879_v53 = vadd.f32 %v1878_v51, %v1622_v49  ;;  %v1880_v54 = vpop.f32.mrb[43].mxu1 }
 0x31d   :  { %2051 = vst.msk [vmem:[%s3617_s7 + $0x88] sm:$0xff] %vm2033_vm4, %v1879_v53 }
 0x31f   :  { %v1627_v55 = vpop.f32.mrb[44].mxu0 }
 0x320   :  { %v1883_v56 = vpop.f32.mrb[44].mxu1  ;;  %v1629_v57 = vpop.f32.mrb[45].mxu0 }
 0x321   :  { %v1884_v58 = vadd.f32 %v1883_v56, %v1627_v55  ;;  %v1885_v59 = vpop.f32.mrb[45].mxu1  ;;  %v1630_v27 = vpop.f32.mrb[46].mxu0 }
 0x322   :  { %v1886_v60 = vpop.f32.mrb[46].mxu1  ;;  %v1632_v61 = vpop.f32.mrb[47].mxu0 }
 0x323   :  { %2052 = vst.msk [vmem:[%s3617_s7 + $0x90] sm:$0xff] %vm2033_vm4, %v1884_v58  ;;  %v1887_v0 = vadd.f32 %v1886_v60, %v1630_v27  ;;  %v1888_v62 = vpop.f32.mrb[47].mxu1 }
 0x325   :  { %2053 = vst.msk [vmem:[%s3617_s7 + $0x98] sm:$0xff] %vm2033_vm4, %v1887_v0 }
 0x327   :  { %v1635_v63 = vpop.f32.mrb[48].mxu0 }
 0x328   :  { %v1891_v1 = vpop.f32.mrb[48].mxu1  ;;  %v1637_v2 = vpop.f32.mrb[49].mxu0 }
 0x329   :  { %v1892_v3 = vadd.f32 %v1891_v1, %v1635_v63  ;;  %v1893_v4 = vpop.f32.mrb[49].mxu1  ;;  %v1638_v5 = vpop.f32.mrb[50].mxu0 }
 0x32a   :  { %v1894_v6 = vpop.f32.mrb[50].mxu1  ;;  %v1640_v7 = vpop.f32.mrb[51].mxu0 }
 0x32b   :  { %2054 = vst.msk [vmem:[%s3617_s7 + $0xa0] sm:$0xff] %vm2033_vm4, %v1892_v3  ;;  %v1895_v8 = vadd.f32 %v1894_v6, %v1638_v5  ;;  %v1896_v9 = vpop.f32.mrb[51].mxu1 }
 0x32d   :  { %2055 = vst.msk [vmem:[%s3617_s7 + $0xa8] sm:$0xff] %vm2033_vm4, %v1895_v8 }
 0x32f   :  { %v1643_v10 = vpop.f32.mrb[52].mxu0 }
 0x330   :  { %v1899_v43 = vpop.f32.mrb[52].mxu1  ;;  %v1645_v11 = vpop.f32.mrb[53].mxu0 }
 0x331   :  { %v1900_v12 = vadd.f32 %v1899_v43, %v1643_v10  ;;  %v1901_v19 = vpop.f32.mrb[53].mxu1  ;;  %v1646_v23 = vpop.f32.mrb[54].mxu0 }
 0x332   :  { %v1902_v24 = vpop.f32.mrb[54].mxu1  ;;  %v1648_v13 = vpop.f32.mrb[55].mxu0 }
 0x333   :  { %2056 = vst.msk [vmem:[%s3617_s7 + $0xb0] sm:$0xff] %vm2033_vm4, %v1900_v12  ;;  %v1903_v14 = vadd.f32 %v1902_v24, %v1646_v23  ;;  %v1904_v15 = vpop.f32.mrb[55].mxu1 }
 0x335   :  { %2057 = vst.msk [vmem:[%s3617_s7 + $0xb8] sm:$0xff] %vm2033_vm4, %v1903_v14 }
 0x337   :  { %v1651_v16 = vpop.f32.mrb[56].mxu0 }
 0x338   :  { %v1907_v17 = vpop.f32.mrb[56].mxu1  ;;  %v1653_v18 = vpop.f32.mrb[57].mxu0 }
 0x339   :  { %v1908_v20 = vadd.f32 %v1907_v17, %v1651_v16  ;;  %v1909_v21 = vpop.f32.mrb[57].mxu1  ;;  %v1654_v22 = vpop.f32.mrb[58].mxu0 }
 0x33a   :  { %v1910_v25 = vpop.f32.mrb[58].mxu1  ;;  %v1656_v26 = vpop.f32.mrb[59].mxu0 }
 0x33b   :  { %2058 = vst.msk [vmem:[%s3617_s7 + $0xc0] sm:$0xff] %vm2033_vm4, %v1908_v20  ;;  %v1911_v47 = vadd.f32 %v1910_v25, %v1654_v22  ;;  %v1912_v50 = vpop.f32.mrb[59].mxu1 }
 0x33d   :  { %2059 = vst.msk [vmem:[%s3617_s7 + $0xc8] sm:$0xff] %vm2033_vm4, %v1911_v47 }
 0x33f   :  { %v1659_v28 = vpop.f32.mrb[60].mxu0 }
 0x340   :  { %v1915_v29 = vpop.f32.mrb[60].mxu1  ;;  %v1661_v30 = vpop.f32.mrb[61].mxu0 }
 0x341   :  { %v1916_v31 = vadd.f32 %v1915_v29, %v1659_v28  ;;  %v1917_v32 = vpop.f32.mrb[61].mxu1  ;;  %v1662_v33 = vpop.f32.mrb[62].mxu0 }
 0x342   :  { %v1918_v34 = vpop.f32.mrb[62].mxu1  ;;  %v1664_v36 = vpop.f32.mrb[63].mxu0 }
 0x343   :  { %2060 = vst.msk [vmem:[%s3617_s7 + $0xd0] sm:$0xff] %vm2033_vm4, %v1916_v31  ;;  %v1919_v41 = vadd.f32 %v1918_v34, %v1662_v33  ;;  %v1920_v35 = vpop.f32.mrb[63].mxu1 }
 0x345   :  { %2061 = vst.msk [vmem:[%s3617_s7 + $0xd8] sm:$0xff] %vm2033_vm4, %v1919_v41 }
 0x347   :  { %v1667_v37 = vpop.f32.mrb[64].mxu0 }
 0x348   :  { %v1923_v38 = vpop.f32.mrb[64].mxu1  ;;  %v1669_v39 = vpop.f32.mrb[65].mxu0 }
 0x349   :  { %v1924_v40 = vadd.f32 %v1923_v38, %v1667_v37  ;;  %v1925_v42 = vpop.f32.mrb[65].mxu1  ;;  %v1670_v44 = vpop.f32.mrb[66].mxu0 }
 0x34a   :  { %v1926_v45 = vpop.f32.mrb[66].mxu1  ;;  %v1672_v46 = vpop.f32.mrb[67].mxu0 }
 0x34b   :  { %2062 = vst.msk [vmem:[%s3617_s7 + $0xe0] sm:$0xff] %vm2033_vm4, %v1924_v40  ;;  %v1927_v48 = vadd.f32 %v1926_v45, %v1670_v44  ;;  %v1928_v49 = vpop.f32.mrb[67].mxu1 }
 0x34d   :  { %2063 = vst.msk [vmem:[%s3617_s7 + $0xe8] sm:$0xff] %vm2033_vm4, %v1927_v48 }
 0x34f   :  { %v1675_v51 = vpop.f32.mrb[68].mxu0 }
 0x350   :  { %v1931_v52 = vpop.f32.mrb[68].mxu1  ;;  %v1677_v53 = vpop.f32.mrb[69].mxu0 }
 0x351   :  { %v1932_v54 = vadd.f32 %v1931_v52, %v1675_v51  ;;  %v1933_v55 = vpop.f32.mrb[69].mxu1  ;;  %v1678_v56 = vpop.f32.mrb[70].mxu0 }
 0x352   :  { %v1934_v57 = vpop.f32.mrb[70].mxu1  ;;  %v1680_v58 = vpop.f32.mrb[71].mxu0 }
 0x353   :  { %2064 = vst.msk [vmem:[%s3617_s7 + $0xf0] sm:$0xff] %vm2033_vm4, %v1932_v54  ;;  %v1935_v59 = vadd.f32 %v1934_v57, %v1678_v56  ;;  %v1936_v27 = vpop.f32.mrb[71].mxu1 }
 0x355   :  { %2065 = vst.msk [vmem:[%s3617_s7 + $0xf8] sm:$0xff] %vm2033_vm4, %v1935_v59 }
 0x357   :  { %v1683_v60 = vpop.f32.mrb[72].mxu0 }
 0x358   :  { %v1939_v61 = vpop.f32.mrb[72].mxu1  ;;  %v1685_v0 = vpop.f32.mrb[73].mxu0 }
 0x359   :  { %v1940_v62 = vadd.f32 %v1939_v61, %v1683_v60  ;;  %v1941_v63 = vpop.f32.mrb[73].mxu1  ;;  %v1686_v1 = vpop.f32.mrb[74].mxu0 }
 0x35a   :  { %v1942_v2 = vpop.f32.mrb[74].mxu1  ;;  %v1688_v3 = vpop.f32.mrb[75].mxu0 }
 0x35b   :  { %2066 = vst.msk [vmem:[%s3617_s7 + $0x100] sm:$0xff] %vm2033_vm4, %v1940_v62  ;;  %v1943_v4 = vadd.f32 %v1942_v2, %v1686_v1  ;;  %v1944_v5 = vpop.f32.mrb[75].mxu1 }
 0x35d   :  { %2067 = vst.msk [vmem:[%s3617_s7 + $0x108] sm:$0xff] %vm2033_vm4, %v1943_v4 }
 0x35f   :  { %v1691_v6 = vpop.f32.mrb[76].mxu0 }
 0x360   :  { %v1947_v7 = vpop.f32.mrb[76].mxu1  ;;  %v1693_v8 = vpop.f32.mrb[77].mxu0 }
 0x361   :  { %v1948_v9 = vadd.f32 %v1947_v7, %v1691_v6  ;;  %v1949_v10 = vpop.f32.mrb[77].mxu1  ;;  %v1694_v43 = vpop.f32.mrb[78].mxu0 }
 0x362   :  { %v1950_v11 = vpop.f32.mrb[78].mxu1  ;;  %v1696_v12 = vpop.f32.mrb[79].mxu0 }
 0x363   :  { %2068 = vst.msk [vmem:[%s3617_s7 + $0x110] sm:$0xff] %vm2033_vm4, %v1948_v9  ;;  %v1951_v19 = vadd.f32 %v1950_v11, %v1694_v43  ;;  %v1952_v23 = vpop.f32.mrb[79].mxu1 }
 0x365   :  { %2069 = vst.msk [vmem:[%s3617_s7 + $0x118] sm:$0xff] %vm2033_vm4, %v1951_v19 }
 0x367   :  { %v1699_v24 = vpop.f32.mrb[80].mxu0 }
 0x368   :  { %v1955_v13 = vpop.f32.mrb[80].mxu1  ;;  %v1701_v14 = vpop.f32.mrb[81].mxu0 }
 0x369   :  { %v1956_v15 = vadd.f32 %v1955_v13, %v1699_v24  ;;  %v1957_v16 = vpop.f32.mrb[81].mxu1  ;;  %v1702_v17 = vpop.f32.mrb[82].mxu0 }
 0x36a   :  { %v1958_v18 = vpop.f32.mrb[82].mxu1  ;;  %v1704_v20 = vpop.f32.mrb[83].mxu0 }
 0x36b   :  { %2070 = vst.msk [vmem:[%s3617_s7 + $0x120] sm:$0xff] %vm2033_vm4, %v1956_v15  ;;  %v1959_v21 = vadd.f32 %v1958_v18, %v1702_v17  ;;  %v1960_v22 = vpop.f32.mrb[83].mxu1 }
 0x36d   :  { %2071 = vst.msk [vmem:[%s3617_s7 + $0x128] sm:$0xff] %vm2033_vm4, %v1959_v21 }
 0x36f   :  { %v1707_v25 = vpop.f32.mrb[84].mxu0 }
 0x370   :  { %v1963_v26 = vpop.f32.mrb[84].mxu1  ;;  %v1709_v47 = vpop.f32.mrb[85].mxu0 }
 0x371   :  { %v1964_v50 = vadd.f32 %v1963_v26, %v1707_v25  ;;  %v1965_v28 = vpop.f32.mrb[85].mxu1  ;;  %v1710_v29 = vpop.f32.mrb[86].mxu0 }
 0x372   :  { %v1966_v30 = vpop.f32.mrb[86].mxu1  ;;  %v1712_v31 = vpop.f32.mrb[87].mxu0 }
 0x373   :  { %2072 = vst.msk [vmem:[%s3617_s7 + $0x130] sm:$0xff] %vm2033_vm4, %v1964_v50  ;;  %v1967_v32 = vadd.f32 %v1966_v30, %v1710_v29  ;;  %v1968_v33 = vpop.f32.mrb[87].mxu1 }
 0x375   :  { %2073 = vst.msk [vmem:[%s3617_s7 + $0x138] sm:$0xff] %vm2033_vm4, %v1967_v32 }
 0x377   :  { %v1715_v34 = vpop.f32.mrb[88].mxu0 }
 0x378   :  { %v1971_v36 = vpop.f32.mrb[88].mxu1  ;;  %v1717_v41 = vpop.f32.mrb[89].mxu0 }
 0x379   :  { %v1972_v35 = vadd.f32 %v1971_v36, %v1715_v34  ;;  %v1973_v37 = vpop.f32.mrb[89].mxu1  ;;  %v1718_v38 = vpop.f32.mrb[90].mxu0 }
 0x37a   :  { %v1974_v39 = vpop.f32.mrb[90].mxu1  ;;  %v1720_v40 = vpop.f32.mrb[91].mxu0 }
 0x37b   :  { %2074 = vst.msk [vmem:[%s3617_s7 + $0x140] sm:$0xff] %vm2033_vm4, %v1972_v35  ;;  %v1975_v42 = vadd.f32 %v1974_v39, %v1718_v38  ;;  %v1976_v44 = vpop.f32.mrb[91].mxu1 }
 0x37d   :  { %2075 = vst.msk [vmem:[%s3617_s7 + $0x148] sm:$0xff] %vm2033_vm4, %v1975_v42 }
 0x37f   :  { %v1723_v45 = vpop.f32.mrb[92].mxu0 }
 0x380   :  { %v1979_v46 = vpop.f32.mrb[92].mxu1  ;;  %v1725_v48 = vpop.f32.mrb[93].mxu0 }
 0x381   :  { %v1980_v49 = vadd.f32 %v1979_v46, %v1723_v45  ;;  %v1981_v51 = vpop.f32.mrb[93].mxu1  ;;  %v1726_v52 = vpop.f32.mrb[94].mxu0 }
 0x382   :  { %v1982_v53 = vpop.f32.mrb[94].mxu1  ;;  %v1728_v54 = vpop.f32.mrb[95].mxu0 }
 0x383   :  { %2076 = vst.msk [vmem:[%s3617_s7 + $0x150] sm:$0xff] %vm2033_vm4, %v1980_v49  ;;  %v1983_v55 = vadd.f32 %v1982_v53, %v1726_v52  ;;  %v1984_v56 = vpop.f32.mrb[95].mxu1 }
 0x385   :  { %2077 = vst.msk [vmem:[%s3617_s7 + $0x158] sm:$0xff] %vm2033_vm4, %v1983_v55 }
 0x387   :  { %v1731_v57 = vpop.f32.mrb[96].mxu0 }
 0x388   :  { %v1987_v58 = vpop.f32.mrb[96].mxu1  ;;  %v1733_v59 = vpop.f32.mrb[97].mxu0 }
 0x389   :  { %v1988_v27 = vadd.f32 %v1987_v58, %v1731_v57  ;;  %v1989_v60 = vpop.f32.mrb[97].mxu1  ;;  %v1734_v61 = vpop.f32.mrb[98].mxu0 }
 0x38a   :  { %v1990_v0 = vpop.f32.mrb[98].mxu1  ;;  %v1736_v62 = vpop.f32.mrb[99].mxu0 }
 0x38b   :  { %2078 = vst.msk [vmem:[%s3617_s7 + $0x160] sm:$0xff] %vm2033_vm4, %v1988_v27  ;;  %v1991_v63 = vadd.f32 %v1990_v0, %v1734_v61  ;;  %v1992_v1 = vpop.f32.mrb[99].mxu1 }
 0x38d   :  { %2079 = vst.msk [vmem:[%s3617_s7 + $0x168] sm:$0xff] %vm2033_vm4, %v1991_v63 }
 0x38f   :  { %v1739_v2 = vpop.f32.mrb[100].mxu0 }
 0x390   :  { %v1995_v3 = vpop.f32.mrb[100].mxu1  ;;  %v1741_v4 = vpop.f32.mrb[101].mxu0 }
 0x391   :  { %v1996_v5 = vadd.f32 %v1995_v3, %v1739_v2  ;;  %v1997_v6 = vpop.f32.mrb[101].mxu1  ;;  %v1742_v7 = vpop.f32.mrb[102].mxu0 }
 0x392   :  { %v1998_v8 = vpop.f32.mrb[102].mxu1  ;;  %v1744_v9 = vpop.f32.mrb[103].mxu0 }
 0x393   :  { %2080 = vst.msk [vmem:[%s3617_s7 + $0x170] sm:$0xff] %vm2033_vm4, %v1996_v5  ;;  %v1999_v10 = vadd.f32 %v1998_v8, %v1742_v7  ;;  %v2000_v43 = vpop.f32.mrb[103].mxu1 }
 0x395   :  { %2081 = vst.msk [vmem:[%s3617_s7 + $0x178] sm:$0xff] %vm2033_vm4, %v1999_v10 }
 0x397   :  { %v1747_v11 = vpop.f32.mrb[104].mxu0 }
 0x398   :  { %v2003_v12 = vpop.f32.mrb[104].mxu1  ;;  %v1749_v19 = vpop.f32.mrb[105].mxu0 }
 0x399   :  { %v2004_v23 = vadd.f32 %v2003_v12, %v1747_v11  ;;  %v2005_v24 = vpop.f32.mrb[105].mxu1  ;;  %v1750_v13 = vpop.f32.mrb[106].mxu0 }
 0x39a   :  { %v2006_v14 = vpop.f32.mrb[106].mxu1  ;;  %v1752_v15 = vpop.f32.mrb[107].mxu0 }
 0x39b   :  { %2082 = vst.msk [vmem:[%s3617_s7 + $0x180] sm:$0xff] %vm2033_vm4, %v2004_v23  ;;  %v2007_v16 = vadd.f32 %v2006_v14, %v1750_v13  ;;  %v2008_v17 = vpop.f32.mrb[107].mxu1 }
 0x39d   :  { %2083 = vst.msk [vmem:[%s3617_s7 + $0x188] sm:$0xff] %vm2033_vm4, %v2007_v16 }
 0x39f   :  { %v1755_v18 = vpop.f32.mrb[108].mxu0 }
 0x3a0   :  { %v2011_v20 = vpop.f32.mrb[108].mxu1  ;;  %v1757_v21 = vpop.f32.mrb[109].mxu0 }
 0x3a1   :  { %v2012_v22 = vadd.f32 %v2011_v20, %v1755_v18  ;;  %v2013_v25 = vpop.f32.mrb[109].mxu1  ;;  %v1758_v26 = vpop.f32.mrb[110].mxu0 }
 0x3a2   :  { %v2014_v47 = vpop.f32.mrb[110].mxu1  ;;  %v1760_v50 = vpop.f32.mrb[111].mxu0 }
 0x3a3   :  { %2084 = vst.msk [vmem:[%s3617_s7 + $0x190] sm:$0xff] %vm2033_vm4, %v2012_v22  ;;  %v2015_v28 = vadd.f32 %v2014_v47, %v1758_v26  ;;  %v2016_v29 = vpop.f32.mrb[111].mxu1 }
 0x3a5   :  { %2085 = vst.msk [vmem:[%s3617_s7 + $0x198] sm:$0xff] %vm2033_vm4, %v2015_v28 }
 0x3a7   :  { %v1763_v30 = vpop.f32.mrb[112].mxu0 }
 0x3a8   :  { %v2019_v31 = vpop.f32.mrb[112].mxu1  ;;  %v1765_v32 = vpop.f32.mrb[113].mxu0 }
 0x3a9   :  { %v2020_v33 = vadd.f32 %v2019_v31, %v1763_v30  ;;  %v2021_v34 = vpop.f32.mrb[113].mxu1  ;;  %v1766_v36 = vpop.f32.mrb[114].mxu0 }
 0x3aa   :  { %v2022_v41 = vpop.f32.mrb[114].mxu1  ;;  %v1768_v35 = vpop.f32.mrb[115].mxu0 }
 0x3ab   :  { %2086 = vst.msk [vmem:[%s3617_s7 + $0x1a0] sm:$0xff] %vm2033_vm4, %v2020_v33  ;;  %v2023_v37 = vadd.f32 %v2022_v41, %v1766_v36  ;;  %v2024_v38 = vpop.f32.mrb[115].mxu1 }
 0x3ad   :  { %2087 = vst.msk [vmem:[%s3617_s7 + $0x1a8] sm:$0xff] %vm2033_vm4, %v2023_v37 }
 0x3af   :  { %v1771_v39 = vpop.f32.mrb[116].mxu0 }
 0x3b0   :  { %v2027_v40 = vpop.f32.mrb[116].mxu1  ;;  %v1773_v42 = vpop.f32.mrb[117].mxu0 }
 0x3b1   :  { %v2028_v44 = vadd.f32 %v2027_v40, %v1771_v39  ;;  %v2029_v45 = vpop.f32.mrb[117].mxu1  ;;  %v1774_v46 = vpop.f32.mrb[118].mxu0 }
 0x3b2   :  { %v2030_v48 = vpop.f32.mrb[118].mxu1  ;;  %v1775_v49 = vpop.f32.mrb[119].mxu0 }
 0x3b3   :  { %2088 = vst.msk [vmem:[%s3617_s7 + $0x1b0] sm:$0xff] %vm2033_vm4, %v2028_v44  ;;  %v2031_v51 = vpop.f32.mrb[119].mxu1 }

</bundles_post_ra>
